<compile_context>
chip_gen: v7x
topology: tpu7x:2x2x1
jax: 0.10.0
libtpu: 0.0.40
codegen_flags: <defaults>
</compile_context>

<pallas_src>
import math

import jax
import jax.numpy as jnp
from jax.experimental import pallas as pl
from jax.experimental.pallas import tpu as pltpu

# Original (PyTorch) layer widths: encoder 1000->256->64->16->8,
# decoder 8->16->64->256->1000.
_DIMS = [50 * 20, 256, 64, 16, 8, 16, 64, 256, 50 * 20]
_REF_RELU = (0, 1, 2, 4, 5, 6)          # ReLU after these layers in the reference
# Kernel layers after folding layer3 (16->8) into layer4 (8->16) (exact: no
# activation between them): 1000->256->64->16->16->64->256->1000.
_N_LAYERS = 7
# Lane-padded widths used inside the kernel. First/last stay at the exact
# 1000 (full-dim blocks, no wrapper pad/slice); hidden widths pad to >=128 so
# every intermediate vreg is lane-dense. Zero padding is mathematically exact.
_PDIMS = [1000, 256, 128, 128, 128, 128, 256, 1000]


def _round_up(x, m):
    return (x + m - 1) // m * m


def _ae_kernel(x_ref, *refs):
    """refs = (w0, b0, ..., w6, b6, out_ref).

    Weights are bf16 (pin_i, pout_i); biases are f32 (1, pout_i). Matmuls run
    bf16 x bf16 -> f32 on the MXU; bias / ReLU / sigmoid in f32; activations
    are carried between layers in bf16 (the next dot needs bf16 anyway).
    """
    out_ref = refs[-1]
    h = x_ref[...].astype(jnp.bfloat16)          # (TB, 1000)
    for i in range(_N_LAYERS):
        w = refs[2 * i][...]                     # bf16 (pin_i, pout_i)
        b = refs[2 * i + 1][...]                 # f32  (1,    pout_i)
        acc = jnp.dot(h, w, preferred_element_type=jnp.float32) + b
        if i < _N_LAYERS - 1:                    # ReLU after every hidden layer
            h = jnp.maximum(acc, 0.0).astype(jnp.bfloat16)
        else:                                    # final decoder layer: Sigmoid
            out_ref[...] = jax.nn.sigmoid(acc).astype(out_ref.dtype)


def init_params(key):
    """Synthetic init matching the torch module: xavier_uniform weights,
    PyTorch-default uniform(-1/sqrt(fan_in), +) biases. Returns f32 params
    for the original 8 layers, weights stored (in, out) so x @ w applies."""
    params = []
    for i in range(len(_DIMS) - 1):
        fan_in, fan_out = _DIMS[i], _DIMS[i + 1]
        key, kw, kb = jax.random.split(key, 3)
        w_bound = math.sqrt(6.0 / (fan_in + fan_out))
        w = jax.random.uniform(kw, (fan_in, fan_out), jnp.float32,
                               -w_bound, w_bound)
        b_bound = 1.0 / math.sqrt(fan_in)
        b = jax.random.uniform(kb, (1, fan_out), jnp.float32,
                               -b_bound, b_bound)
        params.append((w, b))
    return params


def prepare_params(params):
    """Fold layers 3 & 4 into one linear (exact, no activation between them),
    zero-pad hidden widths to the lane-aligned sizes in _PDIMS, and cast
    weights to bf16 (biases stay f32). Folding/padding done once in f32."""
    (w3, b3), (w4, b4) = params[3], params[4]
    w34 = w3 @ w4                     # (16, 16)
    b34 = b3 @ w4 + b4                # (1, 16)
    fused = list(params[:3]) + [(w34, b34)] + list(params[5:])
    assert len(fused) == _N_LAYERS

    padded = []
    for i, (w, b) in enumerate(fused):
        pin, pout = _PDIMS[i], _PDIMS[i + 1]
        fin, fout = w.shape
        w_p = jnp.zeros((pin, pout), jnp.float32).at[:fin, :fout].set(w)
        b_p = jnp.zeros((1, pout), jnp.float32).at[:, :fout].set(b)
        padded.append((w_p.astype(jnp.bfloat16), b_p))
    return padded


def _pick_batch_tile(B, tile_batch):
    """Batch tile: multiple of 8, no larger than needed, and capped so the
    grid has >= 2 steps when B >= 16 (so v7x megacore has work to shard)."""
    tb = min(tile_batch, _round_up(B, 8))
    if B >= 16:
        tb = min(tb, _round_up(pl.cdiv(B, 2), 8))
    return max(8, tb)


def autoencoder_forward(x, padded_params, *, tile_batch=1024):
    """x: (B, 50, 20) float32 or bfloat16; padded_params: prepare_params()."""
    B = x.shape[0]
    d_in, d_out = _DIMS[0], _DIMS[-1]

    # Free reshape (contiguous), no dtype change, no materialized pad.
    x_flat = x.reshape(B, -1)
    assert x_flat.shape[1] == d_in

    tb = _pick_batch_tile(B, tile_batch)
    grid = (pl.cdiv(B, tb),)

    flat_args = []
    in_specs = [pl.BlockSpec((tb, d_in), lambda i: (i, 0))]
    for w, b in padded_params:
        flat_args.extend([w, b])
        # Constant index_map -> weights/biases stay VMEM-resident (one DMA).
        in_specs.append(pl.BlockSpec(w.shape, lambda i: (0, 0)))
        in_specs.append(pl.BlockSpec(b.shape, lambda i: (0, 0)))

    in_itemsize = jnp.dtype(x_flat.dtype).itemsize
    weight_bytes = sum(int(w.size) * w.dtype.itemsize + int(b.size) * b.dtype.itemsize
                       for w, b in padded_params)
    # VMEM budget: double-buffered consts + x/out double buffers + headroom
    # for in-kernel intermediates / spills. Clamped so the default tile also
    # fits v7x's 64 MiB physical VMEM while exceeding v5e's 16 MiB default.
    vmem_need = (2 * weight_bytes
                 + 2 * tb * d_in * in_itemsize
                 + 2 * tb * d_out * 4
                 + 6 * tb * 1024 * 4)
    vmem_limit = int(min(100 * 1024 * 1024, max(32 * 1024 * 1024, vmem_need)))

    cost = pl.CostEstimate(
        flops=2 * B * sum(int(w.shape[0]) * int(w.shape[1])
                          for w, _ in padded_params),
        transcendentals=B * d_out,
        bytes_accessed=B * d_in * in_itemsize + B * d_out * 4 + weight_bytes,
    )

    out = pl.pallas_call(
        _ae_kernel,
        out_shape=jax.ShapeDtypeStruct((B, d_out), jnp.float32),
        grid=grid,
        in_specs=in_specs,
        out_specs=pl.BlockSpec((tb, d_out), lambda i: (i, 0)),
        compiler_params=pltpu.CompilerParams(
            dimension_semantics=("parallel",),   # megacore on v7x
            vmem_limit_bytes=vmem_limit,
        ),
        cost_estimate=cost,
    )(x_flat, *flat_args)

    return out.reshape(B, 50, 20)


def _reference_forward(x, params):
    """Pure-JAX f32 reference matching the PyTorch forward pass (8 layers)."""
    B = x.shape[0]
    h = x.reshape(B, -1).astype(jnp.float32)
    n = len(params)
    for i, (w, b) in enumerate(params):
        h = h @ w + b
        if i in _REF_RELU:
            h = jnp.maximum(h, 0.0)
        elif i == n - 1:
            h = jax.nn.sigmoid(h)
        # i == 3 (encoder output): no activation
    return h.reshape(B, 50, 20)


if __name__ == "__main__":
    key = jax.random.PRNGKey(0)
    key, kx = jax.random.split(key)

    params = init_params(key)
    padded_params = prepare_params(params)

    # Small batch matching the module's implied input layout.
    B = 2
    x = jax.random.normal(kx, (B, 50, 20), dtype=jnp.float32)
    out = jax.block_until_ready(autoencoder_forward(x, padded_params))
    assert out.shape == (B, 50, 20), out.shape
    assert out.dtype == jnp.float32
    ref = _reference_forward(x, params)
    # bf16 matmul inputs / bf16-carried activations, f32 accumulation.
    assert jnp.allclose(out, ref, atol=2e-2, rtol=2e-2), (
        float(jnp.max(jnp.abs(out - ref))))

    # Non-tile-aligned batch: exercises grid = cdiv(B, tb) with a partial last
    # block (dropped OOB rows) and the >=2-grid-step megacore tile capping.
    key, kx2 = jax.random.split(key)
    B2 = 300
    x2 = jax.random.normal(kx2, (B2, 50, 20), dtype=jnp.float32)
    out2 = jax.block_until_ready(
        autoencoder_forward(x2, padded_params, tile_batch=128))
    ref2 = _reference_forward(x2, params)
    assert out2.shape == (B2, 50, 20)
    assert jnp.allclose(out2, ref2, atol=2e-2, rtol=2e-2), (
        float(jnp.max(jnp.abs(out2 - ref2))))

    # bf16 input path (halves input HBM read when the producer emits bf16).
    x2_bf16 = x2.astype(jnp.bfloat16)
    out3 = jax.block_until_ready(autoencoder_forward(x2_bf16, padded_params))
    ref3 = _reference_forward(x2_bf16.astype(jnp.float32), params)
    assert out3.shape == (B2, 50, 20)
    assert jnp.allclose(out3, ref3, atol=2e-2, rtol=2e-2), (
        float(jnp.max(jnp.abs(out3 - ref3))))

    print("KERNEL_OK")
</pallas_src>

<mosaic_0001>
module attributes {stable_mosaic.version = 11 : i64} {
  func.func @_ae_kernel(%arg0: i32, %arg1: memref<8x1000xf32, #tpu.memory_space<vmem>>, %arg2: memref<1000x256xbf16, #tpu.memory_space<vmem>>, %arg3: memref<1x256xf32, #tpu.memory_space<vmem>>, %arg4: memref<256x128xbf16, #tpu.memory_space<vmem>>, %arg5: memref<1x128xf32, #tpu.memory_space<vmem>>, %arg6: memref<128x128xbf16, #tpu.memory_space<vmem>>, %arg7: memref<1x128xf32, #tpu.memory_space<vmem>>, %arg8: memref<128x128xbf16, #tpu.memory_space<vmem>>, %arg9: memref<1x128xf32, #tpu.memory_space<vmem>>, %arg10: memref<128x128xbf16, #tpu.memory_space<vmem>>, %arg11: memref<1x128xf32, #tpu.memory_space<vmem>>, %arg12: memref<128x256xbf16, #tpu.memory_space<vmem>>, %arg13: memref<1x256xf32, #tpu.memory_space<vmem>>, %arg14: memref<256x1000xbf16, #tpu.memory_space<vmem>>, %arg15: memref<1x1000xf32, #tpu.memory_space<vmem>>, %arg16: memref<8x1000xf32, #tpu.memory_space<vmem>>) attributes {dimension_semantics = [#tpu.dimension_semantics<parallel>], iteration_bounds = array<i64: 1>, scalar_prefetch = 0 : i64, scratch_operands = 0 : i64, tpu.core_type = #tpu.core_type<tc>, window_params = [{transform_indices = @transform_0, window_bounds = array<i64: 8, 1000>}, {pipeline_mode = #tpu.pipeline_mode<synchronous>, transform_indices = @transform_1, window_bounds = array<i64: 1000, 256>}, {pipeline_mode = #tpu.pipeline_mode<synchronous>, transform_indices = @transform_2, window_bounds = array<i64: 1, 256>}, {pipeline_mode = #tpu.pipeline_mode<synchronous>, transform_indices = @transform_3, window_bounds = array<i64: 256, 128>}, {pipeline_mode = #tpu.pipeline_mode<synchronous>, transform_indices = @transform_4, window_bounds = array<i64: 1, 128>}, {pipeline_mode = #tpu.pipeline_mode<synchronous>, transform_indices = @transform_5, window_bounds = array<i64: 128, 128>}, {pipeline_mode = #tpu.pipeline_mode<synchronous>, transform_indices = @transform_6, window_bounds = array<i64: 1, 128>}, {pipeline_mode = #tpu.pipeline_mode<synchronous>, transform_indices = @transform_7, window_bounds = array<i64: 128, 128>}, {pipeline_mode = #tpu.pipeline_mode<synchronous>, transform_indices = @transform_8, window_bounds = array<i64: 1, 128>}, {pipeline_mode = #tpu.pipeline_mode<synchronous>, transform_indices = @transform_9, window_bounds = array<i64: 128, 128>}, {pipeline_mode = #tpu.pipeline_mode<synchronous>, transform_indices = @transform_10, window_bounds = array<i64: 1, 128>}, {pipeline_mode = #tpu.pipeline_mode<synchronous>, transform_indices = @transform_11, window_bounds = array<i64: 128, 256>}, {pipeline_mode = #tpu.pipeline_mode<synchronous>, transform_indices = @transform_12, window_bounds = array<i64: 1, 256>}, {pipeline_mode = #tpu.pipeline_mode<synchronous>, transform_indices = @transform_13, window_bounds = array<i64: 256, 1000>}, {pipeline_mode = #tpu.pipeline_mode<synchronous>, transform_indices = @transform_14, window_bounds = array<i64: 1, 1000>}, {transform_indices = @transform_15, window_bounds = array<i64: 8, 1000>}]} {
    %c0 = arith.constant 0 : index
    %c0_0 = arith.constant 0 : index
    %0 = vector.load %arg1[%c0, %c0_0] : memref<8x1000xf32, #tpu.memory_space<vmem>>, vector<8x1000xf32>
    %1 = arith.truncf %0 : vector<8x1000xf32> to vector<8x1000xbf16>
    %c0_1 = arith.constant 0 : index
    %c0_2 = arith.constant 0 : index
    %2 = vector.load %arg2[%c0_1, %c0_2] : memref<1000x256xbf16, #tpu.memory_space<vmem>>, vector<1000x256xbf16>
    %c0_3 = arith.constant 0 : index
    %c0_4 = arith.constant 0 : index
    %3 = vector.load %arg3[%c0_3, %c0_4] : memref<1x256xf32, #tpu.memory_space<vmem>>, vector<1x256xf32>
    %cst = arith.constant dense<0.000000e+00> : vector<8x256xf32>
    %4 = tpu.matmul %1, %2, %cst {dimension_numbers = #tpu.dot_dimension_numbers<[1], [0], [0], [1], [0, 0, 1, 1], [], []>} : vector<8x1000xbf16>, vector<1000x256xbf16>, vector<8x256xf32> -> vector<8x256xf32>
    %5 = vector.broadcast %3 : vector<1x256xf32> to vector<8x256xf32>
    %6 = arith.addf %4, %5 : vector<8x256xf32>
    %cst_5 = arith.constant 0.000000e+00 : f32
    %7 = vector.broadcast %cst_5 : f32 to vector<8x256xf32>
    %8 = arith.maximumf %6, %7 : vector<8x256xf32>
    %9 = arith.truncf %8 : vector<8x256xf32> to vector<8x256xbf16>
    %c0_6 = arith.constant 0 : index
    %c0_7 = arith.constant 0 : index
    %10 = vector.load %arg4[%c0_6, %c0_7] : memref<256x128xbf16, #tpu.memory_space<vmem>>, vector<256x128xbf16>
    %c0_8 = arith.constant 0 : index
    %c0_9 = arith.constant 0 : index
    %11 = vector.load %arg5[%c0_8, %c0_9] : memref<1x128xf32, #tpu.memory_space<vmem>>, vector<1x128xf32>
    %cst_10 = arith.constant dense<0.000000e+00> : vector<8x128xf32>
    %12 = tpu.matmul %9, %10, %cst_10 {dimension_numbers = #tpu.dot_dimension_numbers<[1], [0], [0], [1], [0, 0, 1, 1], [], []>} : vector<8x256xbf16>, vector<256x128xbf16>, vector<8x128xf32> -> vector<8x128xf32>
    %13 = vector.broadcast %11 : vector<1x128xf32> to vector<8x128xf32>
    %14 = arith.addf %12, %13 : vector<8x128xf32>
    %cst_11 = arith.constant 0.000000e+00 : f32
    %15 = vector.broadcast %cst_11 : f32 to vector<8x128xf32>
    %16 = arith.maximumf %14, %15 : vector<8x128xf32>
    %17 = arith.truncf %16 : vector<8x128xf32> to vector<8x128xbf16>
    %c0_12 = arith.constant 0 : index
    %c0_13 = arith.constant 0 : index
    %18 = vector.load %arg6[%c0_12, %c0_13] : memref<128x128xbf16, #tpu.memory_space<vmem>>, vector<128x128xbf16>
    %c0_14 = arith.constant 0 : index
    %c0_15 = arith.constant 0 : index
    %19 = vector.load %arg7[%c0_14, %c0_15] : memref<1x128xf32, #tpu.memory_space<vmem>>, vector<1x128xf32>
    %cst_16 = arith.constant dense<0.000000e+00> : vector<8x128xf32>
    %20 = tpu.matmul %17, %18, %cst_16 {dimension_numbers = #tpu.dot_dimension_numbers<[1], [0], [0], [1], [0, 0, 1, 1], [], []>} : vector<8x128xbf16>, vector<128x128xbf16>, vector<8x128xf32> -> vector<8x128xf32>
    %21 = vector.broadcast %19 : vector<1x128xf32> to vector<8x128xf32>
    %22 = arith.addf %20, %21 : vector<8x128xf32>
    %cst_17 = arith.constant 0.000000e+00 : f32
    %23 = vector.broadcast %cst_17 : f32 to vector<8x128xf32>
    %24 = arith.maximumf %22, %23 : vector<8x128xf32>
    %25 = arith.truncf %24 : vector<8x128xf32> to vector<8x128xbf16>
    %c0_18 = arith.constant 0 : index
    %c0_19 = arith.constant 0 : index
    %26 = vector.load %arg8[%c0_18, %c0_19] : memref<128x128xbf16, #tpu.memory_space<vmem>>, vector<128x128xbf16>
    %c0_20 = arith.constant 0 : index
    %c0_21 = arith.constant 0 : index
    %27 = vector.load %arg9[%c0_20, %c0_21] : memref<1x128xf32, #tpu.memory_space<vmem>>, vector<1x128xf32>
    %cst_22 = arith.constant dense<0.000000e+00> : vector<8x128xf32>
    %28 = tpu.matmul %25, %26, %cst_22 {dimension_numbers = #tpu.dot_dimension_numbers<[1], [0], [0], [1], [0, 0, 1, 1], [], []>} : vector<8x128xbf16>, vector<128x128xbf16>, vector<8x128xf32> -> vector<8x128xf32>
    %29 = vector.broadcast %27 : vector<1x128xf32> to vector<8x128xf32>
    %30 = arith.addf %28, %29 : vector<8x128xf32>
    %cst_23 = arith.constant 0.000000e+00 : f32
    %31 = vector.broadcast %cst_23 : f32 to vector<8x128xf32>
    %32 = arith.maximumf %30, %31 : vector<8x128xf32>
    %33 = arith.truncf %32 : vector<8x128xf32> to vector<8x128xbf16>
    %c0_24 = arith.constant 0 : index
    %c0_25 = arith.constant 0 : index
    %34 = vector.load %arg10[%c0_24, %c0_25] : memref<128x128xbf16, #tpu.memory_space<vmem>>, vector<128x128xbf16>
    %c0_26 = arith.constant 0 : index
    %c0_27 = arith.constant 0 : index
    %35 = vector.load %arg11[%c0_26, %c0_27] : memref<1x128xf32, #tpu.memory_space<vmem>>, vector<1x128xf32>
    %cst_28 = arith.constant dense<0.000000e+00> : vector<8x128xf32>
    %36 = tpu.matmul %33, %34, %cst_28 {dimension_numbers = #tpu.dot_dimension_numbers<[1], [0], [0], [1], [0, 0, 1, 1], [], []>} : vector<8x128xbf16>, vector<128x128xbf16>, vector<8x128xf32> -> vector<8x128xf32>
    %37 = vector.broadcast %35 : vector<1x128xf32> to vector<8x128xf32>
    %38 = arith.addf %36, %37 : vector<8x128xf32>
    %cst_29 = arith.constant 0.000000e+00 : f32
    %39 = vector.broadcast %cst_29 : f32 to vector<8x128xf32>
    %40 = arith.maximumf %38, %39 : vector<8x128xf32>
    %41 = arith.truncf %40 : vector<8x128xf32> to vector<8x128xbf16>
    %c0_30 = arith.constant 0 : index
    %c0_31 = arith.constant 0 : index
    %42 = vector.load %arg12[%c0_30, %c0_31] : memref<128x256xbf16, #tpu.memory_space<vmem>>, vector<128x256xbf16>
    %c0_32 = arith.constant 0 : index
    %c0_33 = arith.constant 0 : index
    %43 = vector.load %arg13[%c0_32, %c0_33] : memref<1x256xf32, #tpu.memory_space<vmem>>, vector<1x256xf32>
    %cst_34 = arith.constant dense<0.000000e+00> : vector<8x256xf32>
    %44 = tpu.matmul %41, %42, %cst_34 {dimension_numbers = #tpu.dot_dimension_numbers<[1], [0], [0], [1], [0, 0, 1, 1], [], []>} : vector<8x128xbf16>, vector<128x256xbf16>, vector<8x256xf32> -> vector<8x256xf32>
    %45 = vector.broadcast %43 : vector<1x256xf32> to vector<8x256xf32>
    %46 = arith.addf %44, %45 : vector<8x256xf32>
    %cst_35 = arith.constant 0.000000e+00 : f32
    %47 = vector.broadcast %cst_35 : f32 to vector<8x256xf32>
    %48 = arith.maximumf %46, %47 : vector<8x256xf32>
    %49 = arith.truncf %48 : vector<8x256xf32> to vector<8x256xbf16>
    %c0_36 = arith.constant 0 : index
    %c0_37 = arith.constant 0 : index
    %50 = vector.load %arg14[%c0_36, %c0_37] : memref<256x1000xbf16, #tpu.memory_space<vmem>>, vector<256x1000xbf16>
    %c0_38 = arith.constant 0 : index
    %c0_39 = arith.constant 0 : index
    %51 = vector.load %arg15[%c0_38, %c0_39] : memref<1x1000xf32, #tpu.memory_space<vmem>>, vector<1x1000xf32>
    %cst_40 = arith.constant dense<0.000000e+00> : vector<8x1000xf32>
    %52 = tpu.matmul %49, %50, %cst_40 {dimension_numbers = #tpu.dot_dimension_numbers<[1], [0], [0], [1], [0, 0, 1, 1], [], []>} : vector<8x256xbf16>, vector<256x1000xbf16>, vector<8x1000xf32> -> vector<8x1000xf32>
    %53 = vector.broadcast %51 : vector<1x1000xf32> to vector<8x1000xf32>
    %54 = arith.addf %52, %53 : vector<8x1000xf32>
    %55 = arith.negf %54 : vector<8x1000xf32>
    %56 = math.exp %55 : vector<8x1000xf32>
    %cst_41 = arith.constant 1.000000e+00 : f32
    %57 = vector.broadcast %cst_41 : f32 to vector<8x1000xf32>
    %58 = arith.addf %57, %56 : vector<8x1000xf32>
    %59 = arith.divf %57, %58 : vector<8x1000xf32>
    %c0_42 = arith.constant 0 : index
    %c0_43 = arith.constant 0 : index
    %60 = vector.load %arg16[%c0_42, %c0_43] : memref<8x1000xf32, #tpu.memory_space<vmem>>, vector<8x1000xf32>
    tpu.vector_store %arg16[%c0_42, %c0_43], %59 {strides = array<i32>} : memref<8x1000xf32, #tpu.memory_space<vmem>>, vector<8x1000xf32>,
    return
  }
  func.func @transform_0(%arg0: i32) -> (i32, i32) {
    %c0_i32 = arith.constant 0 : i32
    %c0_i32_0 = arith.constant 0 : i32
    return %arg0, %c0_i32 : i32, i32
  }
  func.func @transform_1(%arg0: i32) -> (i32, i32) {
    %c0_i32 = arith.constant 0 : i32
    %c0_i32_0 = arith.constant 0 : i32
    %c0_i32_1 = arith.constant 0 : i32
    return %c0_i32, %c0_i32_0 : i32, i32
  }
  func.func @transform_2(%arg0: i32) -> (i32, i32) {
    %c0_i32 = arith.constant 0 : i32
    %c0_i32_0 = arith.constant 0 : i32
    %c0_i32_1 = arith.constant 0 : i32
    return %c0_i32, %c0_i32_0 : i32, i32
  }
  func.func @transform_3(%arg0: i32) -> (i32, i32) {
    %c0_i32 = arith.constant 0 : i32
    %c0_i32_0 = arith.constant 0 : i32
    %c0_i32_1 = arith.constant 0 : i32
    return %c0_i32, %c0_i32_0 : i32, i32
  }
  func.func @transform_4(%arg0: i32) -> (i32, i32) {
    %c0_i32 = arith.constant 0 : i32
    %c0_i32_0 = arith.constant 0 : i32
    %c0_i32_1 = arith.constant 0 : i32
    return %c0_i32, %c0_i32_0 : i32, i32
  }
  func.func @transform_5(%arg0: i32) -> (i32, i32) {
    %c0_i32 = arith.constant 0 : i32
    %c0_i32_0 = arith.constant 0 : i32
    %c0_i32_1 = arith.constant 0 : i32
    return %c0_i32, %c0_i32_0 : i32, i32
  }
  func.func @transform_6(%arg0: i32) -> (i32, i32) {
    %c0_i32 = arith.constant 0 : i32
    %c0_i32_0 = arith.constant 0 : i32
    %c0_i32_1 = arith.constant 0 : i32
    return %c0_i32, %c0_i32_0 : i32, i32
  }
  func.func @transform_7(%arg0: i32) -> (i32, i32) {
    %c0_i32 = arith.constant 0 : i32
    %c0_i32_0 = arith.constant 0 : i32
    %c0_i32_1 = arith.constant 0 : i32
    return %c0_i32, %c0_i32_0 : i32, i32
  }
  func.func @transform_8(%arg0: i32) -> (i32, i32) {
    %c0_i32 = arith.constant 0 : i32
    %c0_i32_0 = arith.constant 0 : i32
    %c0_i32_1 = arith.constant 0 : i32
    return %c0_i32, %c0_i32_0 : i32, i32
  }
  func.func @transform_9(%arg0: i32) -> (i32, i32) {
    %c0_i32 = arith.constant 0 : i32
    %c0_i32_0 = arith.constant 0 : i32
    %c0_i32_1 = arith.constant 0 : i32
    return %c0_i32, %c0_i32_0 : i32, i32
  }
  func.func @transform_10(%arg0: i32) -> (i32, i32) {
    %c0_i32 = arith.constant 0 : i32
    %c0_i32_0 = arith.constant 0 : i32
    %c0_i32_1 = arith.constant 0 : i32
    return %c0_i32, %c0_i32_0 : i32, i32
  }
  func.func @transform_11(%arg0: i32) -> (i32, i32) {
    %c0_i32 = arith.constant 0 : i32
    %c0_i32_0 = arith.constant 0 : i32
    %c0_i32_1 = arith.constant 0 : i32
    return %c0_i32, %c0_i32_0 : i32, i32
  }
  func.func @transform_12(%arg0: i32) -> (i32, i32) {
    %c0_i32 = arith.constant 0 : i32
    %c0_i32_0 = arith.constant 0 : i32
    %c0_i32_1 = arith.constant 0 : i32
    return %c0_i32, %c0_i32_0 : i32, i32
  }
  func.func @transform_13(%arg0: i32) -> (i32, i32) {
    %c0_i32 = arith.constant 0 : i32
    %c0_i32_0 = arith.constant 0 : i32
    %c0_i32_1 = arith.constant 0 : i32
    return %c0_i32, %c0_i32_0 : i32, i32
  }
  func.func @transform_14(%arg0: i32) -> (i32, i32) {
    %c0_i32 = arith.constant 0 : i32
    %c0_i32_0 = arith.constant 0 : i32
    %c0_i32_1 = arith.constant 0 : i32
    return %c0_i32, %c0_i32_0 : i32, i32
  }
  func.func @transform_15(%arg0: i32) -> (i32, i32) {
    %c0_i32 = arith.constant 0 : i32
    %c0_i32_0 = arith.constant 0 : i32
    return %arg0, %c0_i32 : i32, i32
  }
}

</mosaic_0001>

<bundles_post_ra>
// kernel: tpu_custom_call.1
= control target key start
LH: loop header
LB: loop body
LE: loop exit
PB: predicated region body
PF: predicated region fallthrough
CT: control target
= control target key end

     0   :  { %20 = vsyncpa [#allocation3], 0  ;;  %v3681_v9 = vmov 1983009808   ;;  %v75_v11 = vlaneseq  ;;  %vm918_vm0 = vcmask 850944   ;;  %vm922_vm1 = vcmask 1043456   ;;  %s4884_s0 = inlined_call_operand.vmem [shape: f32[2,1000], index: 0, kind: input, shape index: {}]   ;;  %s4885_s1 = inlined_call_operand.vmem [shape: bf16[1000,256], index: 1, kind: input, shape index: {}]   ;;  %s4886_s2 = inlined_call_operand.vmem [shape: f32[1,256], index: 2, kind: input, shape index: {}]   ;;  %s4887_s3 = inlined_call_operand.vmem [shape: bf16[256,128], index: 3, kind: input, shape index: {}]   ;;  %s4888_s4 = inlined_call_operand.vmem [shape: f32[1,128], index: 4, kind: input, shape index: {}]   ;;  %s4889_s5 = inlined_call_operand.vmem [shape: bf16[128,128], index: 5, kind: input, shape index: {}]   ;;  %s4890_s6 = inlined_call_operand.vmem [shape: f32[1,128], index: 6, kind: input, shape index: {}]   ;;  %s4891_s7 = inlined_call_operand.vmem [shape: bf16[128,128], index: 7, kind: input, shape index: {}]   ;;  %s4892_s8 = inlined_call_operand.vmem [shape: f32[1,128], index: 8, kind: input, shape index: {}]   ;;  %s4893_s9 = inlined_call_operand.vmem [shape: bf16[128,128], index: 9, kind: input, shape index: {}]   ;;  %s4894_s10 = inlined_call_operand.vmem [shape: f32[1,128], index: 10, kind: input, shape index: {}]   ;;  %s4895_s11 = inlined_call_operand.vmem [shape: bf16[128,256], index: 11, kind: input, shape index: {}]   ;;  %s4896_s12 = inlined_call_operand.vmem [shape: f32[1,256], index: 12, kind: input, shape index: {}]   ;;  %s4897_s13 = inlined_call_operand.vmem [shape: bf16[256,1000], index: 13, kind: input, shape index: {}]   ;;  %s4898_s14 = inlined_call_operand.vmem [shape: f32[1,1000], index: 14, kind: input, shape index: {}]   ;;  %s4899_s15 = inlined_call_operand.hbm [shape: f32[2,1000], index: 15, kind: output, shape index: {}]  }
   0x1   :  { %v3361_v0 = vld [vmem:[%s4885_s1 + $0x4] ss:$8 sps:$4 sm:$0xff]   ;;  %v3363_v1 = vld [vmem:[%s4885_s1] ss:$8 sps:$4 sm:$0xff]   ;;  %v3364_v2 = vld [vmem:[%s4885_s1 + $0x14] ss:$8 sps:$4 sm:$0xff]   ;;  %v73_v10 = vunpack.c.l.s4 %v3681_v9 }
   0x2   :  { %929 = vmatprep.subr.bf16.mxu0 %v3361_v0  ;;  %v3366_v3 = vld [vmem:[%s4885_s1 + $0x10] ss:$8 sps:$4 sm:$0xff]   ;;  %v3367_v4 = vld [vmem:[%s4885_s1 + $0x24] ss:$8 sps:$4 sm:$0xff]   ;;  %v3369_v5 = vld [vmem:[%s4885_s1 + $0x20] ss:$8 sps:$4 sm:$0xff]  }
   0x3   :  { %930 = vmatpush1.bf16.msra.mxu0 %v3363_v1  ;;  %v3370_v6 = vld [vmem:[%s4885_s1 + $0x34] ss:$8 sps:$4 sm:$0xff]   ;;  %v3372_v7 = vld [vmem:[%s4885_s1 + $0x30] ss:$8 sps:$4 sm:$0xff]   ;;  %v3373_v8 = vld [vmem:[%s4885_s1 + $0x44] ss:$8 sps:$4 sm:$0xff]   ;;  %v74_v14 = vunpack.c.0.s8 %v73_v10 }
   0x4   :  { %931 = vmatprep.subr.bf16.mxu0 %v3364_v2  ;;  %v3375_v12 = vld [vmem:[%s4885_s1 + $0x40] ss:$8 sps:$4 sm:$0xff]   ;;  %v3376_v13 = vld [vmem:[%s4885_s1 + $0x54] ss:$8 sps:$4 sm:$0xff]   ;;  %v3801_v15 = vshrl.u32 %v75_v11, 7  ;;  %vm3683_vm2 = vmmov 0  }
   0x5   :  { %v3378_v16 = vld [vmem:[%s4885_s1 + $0x50] ss:$8 sps:$4 sm:$0xff]   ;;  %v3379_v17 = vld [vmem:[%s4885_s1 + $0x64] ss:$8 sps:$4 sm:$0xff]   ;;  %v3381_v19 = vld [vmem:[%s4885_s1 + $0x60] ss:$8 sps:$4 sm:$0xff]  }
   0x6   :  { %v3810_v18 = vsub.s32 %v74_v14, %v3801_v15  ;;  %v3409_v20 = vld [vmem:[%s4884_s0] ss:$16 sps:$4 sm:$0xff]   ;;  %v3411_v21 = vld [vmem:[%s4884_s0 + $0x4] ss:$16 sps:$4 sm:$0xff]   ;;  %v3511_v57 = vld [vmem:[%s4884_s0 + $0x8] ss:$16 sps:$4 sm:$0xff]  }
   0x7   :  { %932 = vmatpush1.bf16.msra.mxu0 %v3366_v3  ;;  %v3412_v22 = vld [vmem:[%s4884_s0 + $0x20] ss:$16 sps:$4 sm:$0xff]   ;;  %v3414_v23 = vld [vmem:[%s4884_s0 + $0x24] ss:$16 sps:$4 sm:$0xff]   ;;  %v3514_v59 = vld [vmem:[%s4884_s0 + $0x28] ss:$16 sps:$4 sm:$0xff]  }
   0x8   :  { %933 = vmatprep.subr.bf16.mxu0 %v3367_v4  ;;  %v3382_v24 = vld [vmem:[%s4885_s1 + $0x74] ss:$8 sps:$4 sm:$0xff]   ;;  %v78_v25 = vrot.slane %v3409_v20, %v3810_v18  ;;  %v92_v26 = vrot.slane %v3412_v22, %v3810_v18  ;;  %v85_v27 = vrot.slane %v3411_v21, %v3810_v18  ;;  %v99_v28 = vrot.slane %v3414_v23, %v3810_v18  ;;  %v3384_v30 = vld [vmem:[%s4885_s1 + $0x70] ss:$8 sps:$4 sm:$0xff]   ;;  %v3385_v32 = vld [vmem:[%s4885_s1 + $0x84] ss:$8 sps:$4 sm:$0xff]  }
   0x9   :  { %v3387_v34 = vld [vmem:[%s4885_s1 + $0x80] ss:$8 sps:$4 sm:$0xff]   ;;  %v3388_v35 = vld [vmem:[%s4885_s1 + $0x94] ss:$8 sps:$4 sm:$0xff]   ;;  %v3390_v36 = vld [vmem:[%s4885_s1 + $0x90] ss:$8 sps:$4 sm:$0xff]   ;;  %v114_v60 = vrot.slane %v3511_v57, %v3810_v18  ;;  %v128_v61 = vrot.slane %v3514_v59, %v3810_v18 }
   0xa   :  { %v101_v29 = vcombine.high %v78_v25, %v92_v26  ;;  %v3837_v31 = vcombine.low %v85_v27, %v99_v28  ;;  %v3391_v37 = vld [vmem:[%s4885_s1 + $0xa4] ss:$8 sps:$4 sm:$0xff]   ;;  %v3393_v38 = vld [vmem:[%s4885_s1 + $0xa0] ss:$8 sps:$4 sm:$0xff]   ;;  %v3394_v39 = vld [vmem:[%s4885_s1 + $0xb4] ss:$8 sps:$4 sm:$0xff]   ;;  %v100_v48 = vcombine.low %v78_v25, %v92_v26  ;;  %v103_v50 = vcombine.high %v85_v27, %v99_v28 }
   0xb   :  { %934 = vmatpush1.bf16.msra.mxu0 %v3369_v5  ;;  %v3396_v40 = vld [vmem:[%s4885_s1 + $0xb0] ss:$8 sps:$4 sm:$0xff]   ;;  %v3397_v41 = vld [vmem:[%s4885_s1 + $0xc4] ss:$8 sps:$4 sm:$0xff]   ;;  %v3399_v42 = vld [vmem:[%s4885_s1 + $0xc0] ss:$8 sps:$4 sm:$0xff]   ;;  %v3916_v0 = vcombine.low %v114_v60, %v128_v61  ;;  %v137_v28 = vcombine.high %v114_v60, %v128_v61 }
   0xc   :  { %935 = vmatprep.subr.bf16.mxu0 %v3370_v6  ;;  %v149_v33 = vpack.c.bf16 %v101_v29, %v101_v29  ;;  %v3400_v43 = vld [vmem:[%s4885_s1 + $0xd4] ss:$8 sps:$4 sm:$0xff]   ;;  %v3402_v44 = vld [vmem:[%s4885_s1 + $0xd0] ss:$8 sps:$4 sm:$0xff]   ;;  %v3403_v45 = vld [vmem:[%s4885_s1 + $0xe4] ss:$8 sps:$4 sm:$0xff]   ;;  %v148_v52 = vpack.c.bf16 %v100_v48, %v100_v48  ;;  %v151_v54 = vpack.c.bf16 %v103_v50, %v103_v50 }
   0xd   :  { %v3405_v46 = vld [vmem:[%s4885_s1 + $0xe0] ss:$8 sps:$4 sm:$0xff]   ;;  %v3406_v47 = vld [vmem:[%s4885_s1 + $0xf4] ss:$8 sps:$4 sm:$0xff]   ;;  %v3408_v49 = vld [vmem:[%s4885_s1 + $0xf0] ss:$8 sps:$4 sm:$0xff]  }
   0xe   :  { %961 = vmatprep.mubr.bf16.mxu0 %v149_v33  ;;  %v3417_v51 = vld [vmem:[%s4885_s1 + $0x104] ss:$8 sps:$4 sm:$0xff]   ;;  %v3415_v53 = vld [vmem:[%s4885_s1 + $0x100] ss:$8 sps:$4 sm:$0xff]   ;;  %v3420_v55 = vld [vmem:[%s4885_s1 + $0x114] ss:$8 sps:$4 sm:$0xff]   ;;  %v153_v33 = vpack.c.bf16 %v137_v28, %v137_v28 }
   0xf   :  { %936 = vmatpush1.bf16.msra.mxu0 %v3372_v7  ;;  %v3418_v56 = vld [vmem:[%s4885_s1 + $0x110] ss:$8 sps:$4 sm:$0xff]   ;;  %v3423_v58 = vld [vmem:[%s4885_s1 + $0x124] ss:$8 sps:$4 sm:$0xff]   ;;  %v3421_v62 = vld [vmem:[%s4885_s1 + $0x120] ss:$8 sps:$4 sm:$0xff]  }
  0x10   :  { %937 = vmatprep.subr.bf16.mxu0 %v3373_v8  ;;  %v3426_v63 = vld [vmem:[%s4885_s1 + $0x134] ss:$8 sps:$4 sm:$0xff]   ;;  %v3424_v1 = vld [vmem:[%s4885_s1 + $0x130] ss:$8 sps:$4 sm:$0xff]   ;;  %v3429_v2 = vld [vmem:[%s4885_s1 + $0x144] ss:$8 sps:$4 sm:$0xff]  }
  0x11   :  { %v3427_v3 = vld [vmem:[%s4885_s1 + $0x140] ss:$8 sps:$4 sm:$0xff]   ;;  %v3432_v4 = vld [vmem:[%s4885_s1 + $0x154] ss:$8 sps:$4 sm:$0xff]   ;;  %v3430_v5 = vld [vmem:[%s4885_s1 + $0x150] ss:$8 sps:$4 sm:$0xff]  }
  0x12   :  { %v3435_v6 = vld [vmem:[%s4885_s1 + $0x164] ss:$8 sps:$4 sm:$0xff]   ;;  %v3433_v7 = vld [vmem:[%s4885_s1 + $0x160] ss:$8 sps:$4 sm:$0xff]   ;;  %v3438_v8 = vld [vmem:[%s4885_s1 + $0x174] ss:$8 sps:$4 sm:$0xff]  }
  0x13   :  { %938 = vmatpush1.bf16.msra.mxu0 %v3375_v12  ;;  %v3436_v9 = vld [vmem:[%s4885_s1 + $0x170] ss:$8 sps:$4 sm:$0xff]   ;;  %v3441_v10 = vld [vmem:[%s4885_s1 + $0x184] ss:$8 sps:$4 sm:$0xff]   ;;  %v3439_v11 = vld [vmem:[%s4885_s1 + $0x180] ss:$8 sps:$4 sm:$0xff]  }
  0x14   :  { %939 = vmatprep.subr.bf16.mxu0 %v3376_v13  ;;  %v3444_v12 = vld [vmem:[%s4885_s1 + $0x194] ss:$8 sps:$4 sm:$0xff]   ;;  %v3442_v13 = vld [vmem:[%s4885_s1 + $0x190] ss:$8 sps:$4 sm:$0xff]   ;;  %v3447_v14 = vld [vmem:[%s4885_s1 + $0x1a4] ss:$8 sps:$4 sm:$0xff]  }
  0x15   :  { %v3453_v20 = vld [vmem:[%s4885_s1 + $0x1c4] ss:$8 sps:$4 sm:$0xff]   ;;  %v3451_v21 = vld [vmem:[%s4885_s1 + $0x1c0] ss:$8 sps:$4 sm:$0xff]   ;;  %v3456_v22 = vld [vmem:[%s4885_s1 + $0x1d4] ss:$8 sps:$4 sm:$0xff]  }
  0x16   :  { %v3454_v23 = vld [vmem:[%s4885_s1 + $0x1d0] ss:$8 sps:$4 sm:$0xff]   ;;  %v3457_v25 = vld [vmem:[%s4885_s1 + $0x1e0] ss:$8 sps:$4 sm:$0xff]   ;;  %v3462_v26 = vld [vmem:[%s4885_s1 + $0x1f4] ss:$8 sps:$4 sm:$0xff]  }
  0x17   :  { %940 = vmatpush1.bf16.msra.mxu0 %v3378_v16  ;;  %v3445_v16 = vld [vmem:[%s4885_s1 + $0x1a0] ss:$8 sps:$4 sm:$0xff]   ;;  %v3460_v27 = vld [vmem:[%s4885_s1 + $0x1f0] ss:$8 sps:$4 sm:$0xff]   ;;  %v3465_v29 = vld [vmem:[%s4885_s1 + $0x204] ss:$8 sps:$4 sm:$0xff]  }
  0x18   :  { %941 = vmatprep.subr.bf16.mxu0 %v3379_v17  ;;  %v3450_v17 = vld [vmem:[%s4885_s1 + $0x1b4] ss:$8 sps:$4 sm:$0xff]   ;;  %v3487_v48 = vld [vmem:[%s4885_s1 + $0x280] ss:$8 sps:$4 sm:$0xff]   ;;  %v3490_v50 = vld [vmem:[%s4885_s1 + $0x290] ss:$8 sps:$4 sm:$0xff]  }
  0x19   :  { %v3504_v57 = vld [vmem:[%s4885_s1 + $0x2d4] ss:$8 sps:$4 sm:$0xff]   ;;  %v3507_v61 = vld [vmem:[%s4885_s1 + $0x2e4] ss:$8 sps:$4 sm:$0xff]   ;;  %vm2877_vm3 = vcmask 1041408   ;;  %vm2878_vm4 = vcmask 1043458  }
  0x1a   :  { %v3513_v59 = vld [vmem:[%s4884_s0 + $0xc] ss:$16 sps:$4 sm:$0xff]   ;;  %vm2879_vm5 = vmor %vm2878_vm4, %vm2877_vm3  ;;  %vm2880_vm6 = vcmask 1045508   ;;  %vm2882_vm8 = vcmask 850950  }
  0x1b   :  { %942 = vmatpush1.bf16.msra.mxu0 %v3381_v19  ;;  %v3448_v19 = vld [vmem:[%s4885_s1 + $0x1b0] ss:$8 sps:$4 sm:$0xff]   ;;  %v3516_v60 = vld [vmem:[%s4884_s0 + $0x2c] ss:$16 sps:$4 sm:$0xff]   ;;  %vm2881_vm7 = vmor %vm2880_vm6, %vm2879_vm5 }
  0x1c   :  { %943 = vmatprep.subr.bf16.mxu0 %v3382_v24  ;;  %v3459_v24 = vld [vmem:[%s4885_s1 + $0x1e4] ss:$8 sps:$4 sm:$0xff]   ;;  %vm2883_vm9 = vmor %vm2882_vm8, %vm2881_vm7 }
  0x1d   :  { %v3549_v28 = vld [vmem:[%s4885_s1 + $0x3a4] ss:$8 sps:$4 sm:$0xff]  }
  0x1f   :  { %944 = vmatpush1.bf16.msra.mxu0 %v3384_v30  ;;  %v150_v30 = vpack.c.bf16 %v3837_v31, %v3837_v31  ;;  %v3471_v31 = vld [vmem:[%s4885_s1 + $0x224] ss:$8 sps:$4 sm:$0xff]  }
  0x20   :  { %945 = vmatprep.subr.bf16.mxu0 %v3385_v32  ;;  %v3463_v32 = vld [vmem:[%s4885_s1 + $0x200] ss:$8 sps:$4 sm:$0xff]  }
  0x23   :  { %946 = vmatpush1.bf16.msra.mxu0 %v3387_v34  ;;  %v3468_v34 = vld [vmem:[%s4885_s1 + $0x214] ss:$8 sps:$4 sm:$0xff]  }
  0x24   :  { %947 = vmatprep.subr.bf16.mxu0 %v3388_v35  ;;  %v3466_v35 = vld [vmem:[%s4885_s1 + $0x210] ss:$8 sps:$4 sm:$0xff]  }
  0x27   :  { %948 = vmatpush1.bf16.msra.mxu0 %v3390_v36  ;;  %v3469_v36 = vld [vmem:[%s4885_s1 + $0x220] ss:$8 sps:$4 sm:$0xff]  }
  0x28   :  { %949 = vmatprep.subr.bf16.mxu0 %v3391_v37  ;;  %v3474_v37 = vld [vmem:[%s4885_s1 + $0x234] ss:$8 sps:$4 sm:$0xff]  }
  0x2b   :  { %950 = vmatpush1.bf16.msra.mxu0 %v3393_v38  ;;  %v3472_v38 = vld [vmem:[%s4885_s1 + $0x230] ss:$8 sps:$4 sm:$0xff]  }
  0x2c   :  { %951 = vmatprep.subr.bf16.mxu0 %v3394_v39  ;;  %v3477_v39 = vld [vmem:[%s4885_s1 + $0x244] ss:$8 sps:$4 sm:$0xff]  }
  0x2f   :  { %952 = vmatpush1.bf16.msra.mxu0 %v3396_v40  ;;  %v3475_v40 = vld [vmem:[%s4885_s1 + $0x240] ss:$8 sps:$4 sm:$0xff]  }
  0x30   :  { %953 = vmatprep.subr.bf16.mxu0 %v3397_v41  ;;  %v3480_v41 = vld [vmem:[%s4885_s1 + $0x254] ss:$8 sps:$4 sm:$0xff]  }
  0x33   :  { %954 = vmatpush1.bf16.msra.mxu0 %v3399_v42  ;;  %v3478_v42 = vld [vmem:[%s4885_s1 + $0x250] ss:$8 sps:$4 sm:$0xff]  }
  0x34   :  { %955 = vmatprep.subr.bf16.mxu0 %v3400_v43  ;;  %v3483_v43 = vld [vmem:[%s4885_s1 + $0x264] ss:$8 sps:$4 sm:$0xff]  }
  0x37   :  { %956 = vmatpush1.bf16.msra.mxu0 %v3402_v44  ;;  %v3481_v44 = vld [vmem:[%s4885_s1 + $0x260] ss:$8 sps:$4 sm:$0xff]  }
  0x38   :  { %957 = vmatprep.subr.bf16.mxu0 %v3403_v45  ;;  %v3486_v45 = vld [vmem:[%s4885_s1 + $0x274] ss:$8 sps:$4 sm:$0xff]  }
  0x3b   :  { %958 = vmatpush1.bf16.msra.mxu0 %v3405_v46  ;;  %v3484_v46 = vld [vmem:[%s4885_s1 + $0x270] ss:$8 sps:$4 sm:$0xff]  }
  0x3c   :  { %959 = vmatprep.subr.bf16.mxu0 %v3406_v47  ;;  %v3489_v47 = vld [vmem:[%s4885_s1 + $0x284] ss:$8 sps:$4 sm:$0xff]  }
  0x3f   :  { %960 = vmatpush1.bf16.msra.mxu0 %v3408_v49  ;;  %v3492_v49 = vld [vmem:[%s4885_s1 + $0x294] ss:$8 sps:$4 sm:$0xff]  }
  0x40   :  { %970 = vmatprep.subr.bf16.mxu0 %v3417_v51  ;;  %v3495_v51 = vld [vmem:[%s4885_s1 + $0x2a4] ss:$8 sps:$4 sm:$0xff]  }
  0x42   :  { %962 = vmatmul.mubr.bf16.vlgmr.msra.gmra.mrb[0].mxu0 %v148_v52  ;;  %v3493_v52 = vld [vmem:[%s4885_s1 + $0x2a0] ss:$8 sps:$4 sm:$0xff]  }
  0x43   :  { %971 = vmatpush1.bf16.msra.mxu0 %v3415_v53  ;;  %1002 = vmatprep.mubr.bf16.mxu0 %v151_v54  ;;  %v3498_v53 = vld [vmem:[%s4885_s1 + $0x2b4] ss:$8 sps:$4 sm:$0xff]   ;;  %v3496_v54 = vld [vmem:[%s4885_s1 + $0x2b0] ss:$8 sps:$4 sm:$0xff]  }
  0x44   :  { %972 = vmatprep.subr.bf16.mxu0 %v3420_v55  ;;  %v3501_v55 = vld [vmem:[%s4885_s1 + $0x2c4] ss:$8 sps:$4 sm:$0xff]  }
  0x47   :  { %973 = vmatpush1.bf16.msra.mxu0 %v3418_v56  ;;  %v3499_v56 = vld [vmem:[%s4885_s1 + $0x2c0] ss:$8 sps:$4 sm:$0xff]  }
  0x48   :  { %974 = vmatprep.subr.bf16.mxu0 %v3423_v58  ;;  %v3502_v58 = vld [vmem:[%s4885_s1 + $0x2d0] ss:$8 sps:$4 sm:$0xff]  }
  0x4b   :  { %975 = vmatpush1.bf16.msra.mxu0 %v3421_v62  ;;  %v3505_v62 = vld [vmem:[%s4885_s1 + $0x2e0] ss:$8 sps:$4 sm:$0xff]  }
  0x4c   :  { %976 = vmatprep.subr.bf16.mxu0 %v3426_v63  ;;  %v4092_v63 = vrot.slane %v3513_v59, %v3810_v18  ;;  %v3682_v59 = vmov 0.0  }
  0x4d   :  { %3280 = vmatprep.subr.bf16.mxu1 %v3682_v59  ;;  %3296 = vmatprep.mubr.msk.bf16.mxu1 %vm3683_vm2, %v3682_v59 }
  0x4f   :  { %977 = vmatpush1.bf16.msra.mxu0 %v3424_v1  ;;  %v4095_v1 = vrot.slane %v3516_v60, %v3810_v18  ;;  %v3578_v60 = vld [vmem:[%s4889_s5 + $0x8] sm:$0xff]  }
  0x50   :  { %978 = vmatprep.subr.bf16.mxu0 %v3429_v2  ;;  %v3510_v2 = vld [vmem:[%s4885_s1 + $0x2f4] ss:$8 sps:$4 sm:$0xff]  }
  0x53   :  { %979 = vmatpush1.bf16.msra.mxu0 %v3427_v3  ;;  %v3508_v3 = vld [vmem:[%s4885_s1 + $0x2f0] ss:$8 sps:$4 sm:$0xff]  }
  0x54   :  { %980 = vmatprep.subr.bf16.mxu0 %v3432_v4  ;;  %v139_v4 = vcombine.high %v4092_v63, %v4095_v1 }
  0x57   :  { %981 = vmatpush1.bf16.msra.mxu0 %v3430_v5  ;;  %v3519_v5 = vld [vmem:[%s4885_s1 + $0x304] ss:$8 sps:$4 sm:$0xff]  }
  0x58   :  { %982 = vmatprep.subr.bf16.mxu0 %v3435_v6  ;;  %v152_v6 = vpack.c.bf16 %v3916_v0, %v3916_v0  ;;  %v3525_v0 = vld [vmem:[%s4885_s1 + $0x324] ss:$8 sps:$4 sm:$0xff]  }
  0x5b   :  { %983 = vmatpush1.bf16.msra.mxu0 %v3433_v7  ;;  %v3517_v7 = vld [vmem:[%s4885_s1 + $0x300] ss:$8 sps:$4 sm:$0xff]  }
  0x5c   :  { %984 = vmatprep.subr.bf16.mxu0 %v3438_v8  ;;  %v155_v8 = vpack.c.bf16 %v139_v4, %v139_v4  ;;  %v4276_v4 = vsub.s32 1, %v3801_v15 }
  0x5f   :  { %985 = vmatpush1.bf16.msra.mxu0 %v3436_v9  ;;  %v3522_v9 = vld [vmem:[%s4885_s1 + $0x314] ss:$8 sps:$4 sm:$0xff]  }
  0x60   :  { %986 = vmatprep.subr.bf16.mxu0 %v3441_v10  ;;  %v3520_v10 = vld [vmem:[%s4885_s1 + $0x310] ss:$8 sps:$4 sm:$0xff]  }
  0x63   :  { %987 = vmatpush1.bf16.msra.mxu0 %v3439_v11  ;;  %v3523_v11 = vld [vmem:[%s4885_s1 + $0x320] ss:$8 sps:$4 sm:$0xff]  }
  0x64   :  { %988 = vmatprep.subr.bf16.mxu0 %v3444_v12  ;;  %v3528_v12 = vld [vmem:[%s4885_s1 + $0x334] ss:$8 sps:$4 sm:$0xff]  }
  0x67   :  { %989 = vmatpush1.bf16.msra.mxu0 %v3442_v13  ;;  %v3526_v13 = vld [vmem:[%s4885_s1 + $0x330] ss:$8 sps:$4 sm:$0xff]  }
  0x68   :  { %990 = vmatprep.subr.bf16.mxu0 %v3447_v14  ;;  %v3531_v14 = vld [vmem:[%s4885_s1 + $0x344] ss:$8 sps:$4 sm:$0xff]  }
  0x6b   :  { %991 = vmatpush1.bf16.msra.mxu0 %v3445_v16  ;;  %v3529_v16 = vld [vmem:[%s4885_s1 + $0x340] ss:$8 sps:$4 sm:$0xff]  }
  0x6c   :  { %992 = vmatprep.subr.bf16.mxu0 %v3450_v17  ;;  %v3534_v17 = vld [vmem:[%s4885_s1 + $0x354] ss:$8 sps:$4 sm:$0xff]  }
  0x6f   :  { %993 = vmatpush1.bf16.msra.mxu0 %v3448_v19  ;;  %v3532_v19 = vld [vmem:[%s4885_s1 + $0x350] ss:$8 sps:$4 sm:$0xff]  }
  0x70   :  { %994 = vmatprep.subr.bf16.mxu0 %v3453_v20  ;;  %v3537_v20 = vld [vmem:[%s4885_s1 + $0x364] ss:$8 sps:$4 sm:$0xff]  }
  0x73   :  { %995 = vmatpush1.bf16.msra.mxu0 %v3451_v21  ;;  %v3535_v21 = vld [vmem:[%s4885_s1 + $0x360] ss:$8 sps:$4 sm:$0xff]  }
  0x74   :  { %996 = vmatprep.subr.bf16.mxu0 %v3456_v22  ;;  %v3540_v22 = vld [vmem:[%s4885_s1 + $0x374] ss:$8 sps:$4 sm:$0xff]  }
  0x77   :  { %997 = vmatpush1.bf16.msra.mxu0 %v3454_v23  ;;  %v3538_v23 = vld [vmem:[%s4885_s1 + $0x370] ss:$8 sps:$4 sm:$0xff]  }
  0x78   :  { %998 = vmatprep.subr.bf16.mxu0 %v3459_v24  ;;  %v3543_v24 = vld [vmem:[%s4885_s1 + $0x384] ss:$8 sps:$4 sm:$0xff]  }
  0x7b   :  { %999 = vmatpush1.bf16.msra.mxu0 %v3457_v25  ;;  %v3541_v25 = vld [vmem:[%s4885_s1 + $0x380] ss:$8 sps:$4 sm:$0xff]  }
  0x7c   :  { %1000 = vmatprep.subr.bf16.mxu0 %v3462_v26  ;;  %v3546_v26 = vld [vmem:[%s4885_s1 + $0x394] ss:$8 sps:$4 sm:$0xff]  }
  0x7f   :  { %1001 = vmatpush1.bf16.msra.mxu0 %v3460_v27  ;;  %v3544_v27 = vld [vmem:[%s4885_s1 + $0x390] ss:$8 sps:$4 sm:$0xff]  }
  0x80   :  { %1011 = vmatprep.subr.bf16.mxu0 %v3465_v29  ;;  %v3547_v29 = vld [vmem:[%s4885_s1 + $0x3a0] ss:$8 sps:$4 sm:$0xff]  }
  0x82   :  { %1003 = vmatmul.mubr.bf16.vlgmr.msra.gmra.mrb[0].mxu0 %v150_v30  ;;  %v3552_v30 = vld [vmem:[%s4885_s1 + $0x3b4] ss:$8 sps:$4 sm:$0xff]  }
  0x83   :  { %1012 = vmatpush1.bf16.msra.mxu0 %v3463_v32  ;;  %1043 = vmatprep.mubr.bf16.mxu0 %v153_v33  ;;  %v3550_v32 = vld [vmem:[%s4885_s1 + $0x3b0] ss:$8 sps:$4 sm:$0xff]   ;;  %v3555_v33 = vld [vmem:[%s4885_s1 + $0x3c4] ss:$8 sps:$4 sm:$0xff]  }
  0x84   :  { %1013 = vmatprep.subr.bf16.mxu0 %v3468_v34  ;;  %v3553_v34 = vld [vmem:[%s4885_s1 + $0x3c0] ss:$8 sps:$4 sm:$0xff]  }
  0x87   :  { %1014 = vmatpush1.bf16.msra.mxu0 %v3466_v35  ;;  %v3558_v35 = vld [vmem:[%s4885_s1 + $0x3d4] ss:$8 sps:$4 sm:$0xff]  }
  0x88   :  { %1015 = vmatprep.subr.bf16.mxu0 %v3471_v31  ;;  %v280_v31 = vld [vmem:[%s4885_s1 + $0x3e0] sm:$0xff] }
  0x8b   :  { %1016 = vmatpush1.bf16.msra.mxu0 %v3469_v36  ;;  %v3556_v36 = vld [vmem:[%s4885_s1 + $0x3d0] ss:$8 sps:$4 sm:$0xff]  }
  0x8c   :  { %1017 = vmatprep.subr.bf16.mxu0 %v3474_v37  ;;  %v3032_v37 = vcombine.high %v280_v31, %v280_v31 }
  0x8f   :  { %1018 = vmatpush1.bf16.msra.mxu0 %v3472_v38  ;;  %v3031_v38 = vcombine.low %v280_v31, %v280_v31  ;;  %v3591_v31 = vld [vmem:[%s4891_s7 + $0x30] sm:$0xff]  }
  0x90   :  { %1019 = vmatprep.subr.bf16.mxu0 %v3477_v39  ;;  %v138_v39 = vcombine.low %v4092_v63, %v4095_v1  ;;  %v3581_v63 = vld [vmem:[%s4889_s5 + $0x20] sm:$0xff]   ;;  %v3582_v1 = vld [vmem:[%s4889_s5 + $0x28] sm:$0xff]  }
  0x93   :  { %1020 = vmatpush1.bf16.msra.mxu0 %v3475_v40  ;;  %v924_v40 = vsel %vm922_vm1, %v3031_v38, 0 }
  0x94   :  { %1021 = vmatprep.subr.bf16.mxu0 %v3480_v41  ;;  %v3561_v41 = vld [vmem:[%s4887_s3 + $0x40] sm:$0xff]  }
  0x97   :  { %1022 = vmatpush1.bf16.msra.mxu0 %v3478_v42  ;;  %v154_v42 = vpack.c.bf16 %v138_v39, %v138_v39 }
  0x98   :  { %1023 = vmatprep.subr.bf16.mxu0 %v3483_v43  ;;  %v3562_v43 = vld [vmem:[%s4887_s3] sm:$0xff]  }
  0x9b   :  { %1024 = vmatpush1.bf16.msra.mxu0 %v3481_v44  ;;  %v3563_v44 = vld [vmem:[%s4887_s3 + $0x48] sm:$0xff]  }
  0x9c   :  { %1025 = vmatprep.subr.bf16.mxu0 %v3486_v45  ;;  %v3564_v45 = vld [vmem:[%s4887_s3 + $0x8] sm:$0xff]  }
  0x9f   :  { %1026 = vmatpush1.bf16.msra.mxu0 %v3484_v46  ;;  %v3565_v46 = vld [vmem:[%s4887_s3 + $0x50] sm:$0xff]  }
  0xa0   :  { %1027 = vmatprep.subr.bf16.mxu0 %v3489_v47  ;;  %v3566_v47 = vld [vmem:[%s4887_s3 + $0x10] sm:$0xff]  }
  0xa3   :  { %1028 = vmatpush1.bf16.msra.mxu0 %v3487_v48  ;;  %v3567_v48 = vld [vmem:[%s4887_s3 + $0x58] sm:$0xff]  }
  0xa4   :  { %1029 = vmatprep.subr.bf16.mxu0 %v3492_v49  ;;  %v3568_v49 = vld [vmem:[%s4887_s3 + $0x18] sm:$0xff]  }
  0xa7   :  { %1030 = vmatpush1.bf16.msra.mxu0 %v3490_v50  ;;  %v3569_v50 = vld [vmem:[%s4887_s3 + $0x60] sm:$0xff]  }
  0xa8   :  { %1031 = vmatprep.subr.bf16.mxu0 %v3495_v51  ;;  %v3570_v51 = vld [vmem:[%s4887_s3 + $0x20] sm:$0xff]  }
  0xab   :  { %1032 = vmatpush1.bf16.msra.mxu0 %v3493_v52  ;;  %v3571_v52 = vld [vmem:[%s4887_s3 + $0x68] sm:$0xff]  }
  0xac   :  { %1033 = vmatprep.subr.bf16.mxu0 %v3498_v53  ;;  %v3572_v53 = vld [vmem:[%s4887_s3 + $0x28] sm:$0xff]  }
  0xaf   :  { %1034 = vmatpush1.bf16.msra.mxu0 %v3496_v54  ;;  %v3573_v54 = vld [vmem:[%s4887_s3 + $0x70] sm:$0xff]  }
  0xb0   :  { %1035 = vmatprep.subr.bf16.mxu0 %v3501_v55  ;;  %v3574_v55 = vld [vmem:[%s4887_s3 + $0x30] sm:$0xff]  }
  0xb3   :  { %1036 = vmatpush1.bf16.msra.mxu0 %v3499_v56  ;;  %v3575_v56 = vld [vmem:[%s4887_s3 + $0x78] sm:$0xff]  }
  0xb4   :  { %1037 = vmatprep.subr.bf16.mxu0 %v3504_v57  ;;  %v3576_v57 = vld [vmem:[%s4887_s3 + $0x38] sm:$0xff]  }
  0xb7   :  { %1038 = vmatpush1.bf16.msra.mxu0 %v3502_v58  ;;  %v3577_v58 = vld [vmem:[%s4889_s5] sm:$0xff]  }
  0xb8   :  { %1039 = vmatprep.subr.bf16.mxu0 %v3507_v61  ;;  %3281 = vmatpush3.bf16.msra.mxu1 %v3577_v58  ;;  %v3579_v61 = vld [vmem:[%s4889_s5 + $0x10] sm:$0xff]  }
  0xb9   :  { %3282 = vmatprep.subr.bf16.mxu1 %v3682_v59 }
  0xbb   :  { %1040 = vmatpush1.bf16.msra.mxu0 %v3505_v62  ;;  %v3580_v62 = vld [vmem:[%s4889_s5 + $0x18] sm:$0xff]  }
  0xbc   :  { %1041 = vmatprep.subr.bf16.mxu0 %v3510_v2  ;;  %3283 = vmatpush3.bf16.msra.mxu1 %v3578_v60  ;;  %v4270_v2 = vsub.s32 0, %v3801_v15 }
  0xbd   :  { %3284 = vmatprep.subr.bf16.mxu1 %v3682_v59 }
  0xbf   :  { %1042 = vmatpush1.bf16.msra.mxu0 %v3508_v3  ;;  %v281_v3 = vld [vmem:[%s4886_s2] sm:$0x3] }
  0xc0   :  { %1052 = vmatprep.subr.bf16.mxu0 %v3519_v5  ;;  %3285 = vmatpush3.bf16.msra.mxu1 %v3579_v61  ;;  %v286_v5 = vrot.slane %v281_v3, %v4270_v2  ;;  %v3601_v61 = vld [vmem:[%s4895_s11] ss:$8 sps:$4 sm:$0xff]  }
  0xc1   :  { %3286 = vmatprep.subr.bf16.mxu1 %v3682_v59 }
  0xc2   :  { %1044 = vmatmul.mubr.bf16.vlgmr.msra.gmra.mrb[0].mxu0 %v152_v6  ;;  %v290_v6 = vrot.slane %v281_v3, %v4276_v4  ;;  %v3609_v3 = vld [vmem:[%s4895_s11 + $0x24] ss:$8 sps:$4 sm:$0xff]  }
  0xc3   :  { %1053 = vmatpush1.bf16.msra.mxu0 %v3517_v7  ;;  %3034 = vmatprep.mubr.msk.bf16.mxu0 %vm918_vm0, %v155_v8 }
  0xc4   :  { %1054 = vmatprep.subr.bf16.mxu0 %v3522_v9  ;;  %3287 = vmatpush3.bf16.msra.mxu1 %v3580_v62 }
  0xc5   :  { %3288 = vmatprep.subr.bf16.mxu1 %v3682_v59 }
  0xc7   :  { %1055 = vmatpush1.bf16.msra.mxu0 %v3520_v10 }
  0xc8   :  { %1056 = vmatprep.subr.bf16.mxu0 %v3525_v0  ;;  %3289 = vmatpush3.bf16.msra.mxu1 %v3581_v63  ;;  %v3606_v63 = vld [vmem:[%s4895_s11 + $0x14] ss:$8 sps:$4 sm:$0xff]  }
  0xc9   :  { %3290 = vmatprep.subr.bf16.mxu1 %v3682_v59 }
  0xcb   :  { %1057 = vmatpush1.bf16.msra.mxu0 %v3523_v11 }
  0xcc   :  { %1058 = vmatprep.subr.bf16.mxu0 %v3528_v12  ;;  %3291 = vmatpush3.bf16.msra.mxu1 %v3582_v1  ;;  %v3604_v1 = vld [vmem:[%s4895_s11 + $0x10] ss:$8 sps:$4 sm:$0xff]  }
  0xcd   :  { %3292 = vmatprep.subr.bf16.mxu1 %v3682_v59 }
  0xcf   :  { %1059 = vmatpush1.bf16.msra.mxu0 %v3526_v13 }
  0xd0   :  { %1060 = vmatprep.subr.bf16.mxu0 %v3531_v14 }
  0xd3   :  { %1061 = vmatpush1.bf16.msra.mxu0 %v3529_v16 }
  0xd4   :  { %1062 = vmatprep.subr.bf16.mxu0 %v3534_v17  ;;  %v3583_v17 = vld [vmem:[%s4889_s5 + $0x30] sm:$0xff]  }
  0xd5   :  { %3293 = vmatpush3.bf16.msra.mxu1 %v3583_v17  ;;  %v4417_v17 = vld [vmem:[%s4897_s13] sm:$0xff] }
  0xd6   :  { %3294 = vmatprep.subr.bf16.mxu1 %v3682_v59 }
  0xd7   :  { %1063 = vmatpush1.bf16.msra.mxu0 %v3532_v19  ;;  %v3584_v19 = vld [vmem:[%s4889_s5 + $0x38] sm:$0xff]  }
  0xd8   :  { %1064 = vmatprep.subr.bf16.mxu0 %v3537_v20 }
  0xd9   :  { %3295 = vmatpush3.bf16.msra.mxu1 %v3584_v19  ;;  %v4422_v19 = vld [vmem:[%s4897_s13 + $0x20] sm:$0xff] }
  0xda   :  { %3300 = vmatprep.subr.bf16.mxu1 %v3682_v59 }
  0xdb   :  { %1065 = vmatpush1.bf16.msra.mxu0 %v3535_v21  ;;  %v3035_v21 = vld [vmem:[%s4888_s4] ss:$0 sm:$0xff] }
  0xdc   :  { %1066 = vmatprep.subr.bf16.mxu0 %v3540_v22 }
  0xdf   :  { %1067 = vmatpush1.bf16.msra.mxu0 %v3538_v23 }
  0xe0   :  { %1068 = vmatprep.subr.bf16.mxu0 %v3543_v24 }
  0xe3   :  { %1069 = vmatpush1.bf16.msra.mxu0 %v3541_v25 }
  0xe4   :  { %1070 = vmatprep.subr.bf16.mxu0 %v3546_v26 }
  0xe7   :  { %1071 = vmatpush1.bf16.msra.mxu0 %v3544_v27 }
  0xe8   :  { %1072 = vmatprep.subr.bf16.mxu0 %v3549_v28  ;;  %v3585_v28 = vld [vmem:[%s4891_s7] sm:$0xff]  }
  0xeb   :  { %1073 = vmatpush1.bf16.msra.mxu0 %v3547_v29 }
  0xec   :  { %1074 = vmatprep.subr.bf16.mxu0 %v3552_v30  ;;  %v3586_v30 = vld [vmem:[%s4891_s7 + $0x8] sm:$0xff]  }
  0xef   :  { %1075 = vmatpush1.bf16.msra.mxu0 %v3550_v32  ;;  %v3587_v32 = vld [vmem:[%s4891_s7 + $0x10] sm:$0xff]  }
  0xf0   :  { %1076 = vmatprep.subr.bf16.mxu0 %v3555_v33  ;;  %v3588_v33 = vld [vmem:[%s4891_s7 + $0x18] sm:$0xff]  }
  0xf3   :  { %1077 = vmatpush1.bf16.msra.mxu0 %v3553_v34  ;;  %v3589_v34 = vld [vmem:[%s4891_s7 + $0x20] sm:$0xff]  }
  0xf4   :  { %1078 = vmatprep.subr.bf16.mxu0 %v3558_v35  ;;  %v3590_v35 = vld [vmem:[%s4891_s7 + $0x28] sm:$0xff]  }
  0xf7   :  { %1079 = vmatpush1.bf16.msra.mxu0 %v3556_v36  ;;  %v3592_v36 = vld [vmem:[%s4891_s7 + $0x38] sm:$0xff]  }
  0xf8   :  { %3033 = vmatprep.subr.msk.bf16.mxu0 %vm922_vm1, %v3032_v37  ;;  %v3052_v37 = vld [vmem:[%s4890_s6] ss:$0 sm:$0xff] }
  0xfb   :  { %1081 = vmatpush1.bf16.msra.mxu0 %v924_v40 }
  0xfc   :  { %3231 = vmatprep.subr.bf16.mxu0 %v3561_v41 }
  0xfe   :  { %1085 = vmatmul.mubr.bf16.vlgmr.msra.gmra.mrb[0].mxu0 %v154_v42 }
  0xff   :  { %3232 = vmatpush3.bf16.msra.mxu0 %v3562_v43 }
 0x100   :  { %3233 = vmatprep.subr.bf16.mxu0 %v3563_v44  ;;  %v3593_v44 = vld [vmem:[%s4893_s9] sm:$0xff]  }
 0x103   :  { %3234 = vmatpush3.bf16.msra.mxu0 %v3564_v45 }
 0x104   :  { %3235 = vmatprep.subr.bf16.mxu0 %v3565_v46  ;;  %v3594_v46 = vld [vmem:[%s4893_s9 + $0x8] sm:$0xff]  }
 0x107   :  { %3236 = vmatpush3.bf16.msra.mxu0 %v3566_v47  ;;  %v3595_v47 = vld [vmem:[%s4893_s9 + $0x10] sm:$0xff]  }
 0x108   :  { %3237 = vmatprep.subr.bf16.mxu0 %v3567_v48  ;;  %v3596_v48 = vld [vmem:[%s4893_s9 + $0x18] sm:$0xff]  }
 0x10b   :  { %3238 = vmatpush3.bf16.msra.mxu0 %v3568_v49  ;;  %v3597_v49 = vld [vmem:[%s4893_s9 + $0x20] sm:$0xff]  }
 0x10c   :  { %3239 = vmatprep.subr.bf16.mxu0 %v3569_v50  ;;  %v3598_v50 = vld [vmem:[%s4893_s9 + $0x28] sm:$0xff]  }
 0x10f   :  { %3240 = vmatpush3.bf16.msra.mxu0 %v3570_v51  ;;  %v3599_v51 = vld [vmem:[%s4893_s9 + $0x30] sm:$0xff]  }
 0x110   :  { %3241 = vmatprep.subr.bf16.mxu0 %v3571_v52  ;;  %v3600_v52 = vld [vmem:[%s4893_s9 + $0x38] sm:$0xff]  }
 0x113   :  { %3242 = vmatpush3.bf16.msra.mxu0 %v3572_v53  ;;  %v3603_v53 = vld [vmem:[%s4895_s11 + $0x4] ss:$8 sps:$4 sm:$0xff]  }
 0x114   :  { %3243 = vmatprep.subr.bf16.mxu0 %v3573_v54  ;;  %v3061_v54 = vld [vmem:[%s4892_s8] ss:$0 sm:$0xff] }
 0x117   :  { %3244 = vmatpush3.bf16.msra.mxu0 %v3574_v55 }
 0x118   :  { %3245 = vmatprep.subr.bf16.mxu0 %v3575_v56 }
 0x11b   :  { %3246 = vmatpush3.bf16.msra.mxu0 %v3576_v57 }
 0x1d1   :  { %v1086_v7 = vpop.f32.mrb[0].mxu0 }
 0x1d2   :  { %v3340_v8 = vadd.f32 %v1086_v7, %v286_v5  ;;  %v1088_v9 = vpop.f32.mrb[1].mxu0  ;;  %v3607_v5 = vld [vmem:[%s4895_s11 + $0x20] ss:$8 sps:$4 sm:$0xff]   ;;  %v3610_v7 = vld [vmem:[%s4895_s11 + $0x30] ss:$8 sps:$4 sm:$0xff]  }
 0x1d3   :  { %v3341_v10 = vadd.f32 %v1088_v9, %v290_v6  ;;  %v1090_v0 = vpop.f32.mrb[2].mxu0  ;;  %v3612_v6 = vld [vmem:[%s4895_s11 + $0x34] ss:$8 sps:$4 sm:$0xff]   ;;  %v3613_v9 = vld [vmem:[%s4895_s11 + $0x40] ss:$8 sps:$4 sm:$0xff]  }
 0x1d4   :  { %v1093_v11 = vmax.f32 %v3340_v8, 0.0  ;;  %v1091_v12 = vpop.f32.mrb[3].mxu0  ;;  %v3615_v8 = vld [vmem:[%s4895_s11 + $0x44] ss:$8 sps:$4 sm:$0xff]   ;;  %v3616_v0 = vld [vmem:[%s4895_s11 + $0x50] ss:$8 sps:$4 sm:$0xff]  }
 0x1d5   :  { %v1094_v13 = vmax.f32 %v3341_v10, 0.0  ;;  %v3618_v10 = vld [vmem:[%s4895_s11 + $0x54] ss:$8 sps:$4 sm:$0xff]   ;;  %v3619_v12 = vld [vmem:[%s4895_s11 + $0x60] ss:$8 sps:$4 sm:$0xff]  }
 0x1d6   :  { %v1095_v16 = vpack.c.bf16 %v1093_v11, %v1093_v11  ;;  %v3621_v11 = vld [vmem:[%s4895_s11 + $0x64] ss:$8 sps:$4 sm:$0xff]  }
 0x1d7   :  { %v1096_v14 = vpack.c.bf16 %v1094_v13, %v1094_v13  ;;  %v3624_v13 = vld [vmem:[%s4895_s11 + $0x74] ss:$8 sps:$4 sm:$0xff]  }
 0x1d9   :  { %1264 = vmatprep.mubr.bf16.mxu0 %v1096_v14  ;;  %v3622_v14 = vld [vmem:[%s4895_s11 + $0x70] ss:$8 sps:$4 sm:$0xff]  }
 0x1da   :  { %1265 = vmatmul.mubr.bf16.vlgmr.msra.gmra.mrb[4].mxu0 %v1095_v16  ;;  %v3684_v16 = vmov 0  }
 0x2ad   :  { %v3247_v20 = vpop.f32.mrb[4].mxu0 }
 0x2ae   :  { %v3248_v22 = vpop.f32.mrb[5].mxu0 }
 0x2af   :  { %v3249_v23 = vadd.f32 %v3248_v22, %v3247_v20  ;;  %v3250_v24 = vpop.f32.mrb[6].mxu0  ;;  %v3095_v20 = vcombine.low %v4417_v17, %v4422_v19  ;;  %v1768_v22 = vld [vmem:[%s4897_s13 + $0x10] sm:$0xff] }
 0x2b0   :  { %v3251_v25 = vpop.f32.mrb[7].mxu0 }
 0x2b1   :  { %v1267_v26 = vadd.f32 %v3249_v23, %v3035_v21  ;;  %v3096_v21 = vcombine.high %v4417_v17, %v4422_v19  ;;  %v1772_v23 = vld [vmem:[%s4897_s13 + $0x30] sm:$0xff]  ;;  %v1798_v17 = vld [vmem:[%s4897_s13 + $0x100] sm:$0xff] }
 0x2b2   :  { %v3099_v24 = vcombine.low %v1768_v22, %v1772_v23  ;;  %v3100_v25 = vcombine.high %v1768_v22, %v1772_v23  ;;  %v1802_v19 = vld [vmem:[%s4897_s13 + $0x120] sm:$0xff] }
 0x2b3   :  { %v1272_v27 = vmax.f32 %v1267_v26, 0.0  ;;  %v1776_v26 = vld [vmem:[%s4897_s13 + $0x50] sm:$0xff] }
 0x2b4   :  { %2658 = vmatprep.subr.bf16.mxu0 %v3100_v25 }
 0x2b5   :  { %v1273_v29 = vpack.c.bf16 %v1272_v27, %v1272_v27  ;;  %2659 = vmatpush1.bf16.msra.mxu0 %v3099_v24  ;;  %v1780_v27 = vld [vmem:[%s4897_s13 + $0x70] sm:$0xff] }
 0x2b7   :  { %3297 = vmatmul.mubr.bf16.vlgmr.msra.gmra.mrb[0].mxu1 %v1273_v29  ;;  %v3108_v29 = vcombine.high %v1776_v26, %v1780_v27 }
 0x2b8   :  { %3301 = vmatpush3.bf16.msra.mxu1 %v3585_v28  ;;  %3316 = vmatprep.mubr.msk.bf16.mxu1 %vm3683_vm2, %v3682_v59  ;;  %v3107_v28 = vcombine.low %v1776_v26, %v1780_v27  ;;  %v1774_v26 = vld [vmem:[%s4897_s13 + $0x40] sm:$0xff] }
 0x2b9   :  { %3302 = vmatprep.subr.bf16.mxu1 %v3682_v59  ;;  %2660 = vmatprep.subr.bf16.mxu0 %v3108_v29  ;;  %v1778_v27 = vld [vmem:[%s4897_s13 + $0x60] sm:$0xff] }
 0x2ba   :  { %2661 = vmatpush1.bf16.msra.mxu0 %v3107_v28 }
 0x2bc   :  { %3303 = vmatpush3.bf16.msra.mxu1 %v3586_v30  ;;  %v1784_v30 = vld [vmem:[%s4897_s13 + $0x90] sm:$0xff] }
 0x2bd   :  { %3304 = vmatprep.subr.bf16.mxu1 %v3682_v59 }
 0x2c0   :  { %3305 = vmatpush3.bf16.msra.mxu1 %v3587_v32  ;;  %v1788_v32 = vld [vmem:[%s4897_s13 + $0xb0] sm:$0xff] }
 0x2c1   :  { %3306 = vmatprep.subr.bf16.mxu1 %v3682_v59 }
 0x2c4   :  { %3307 = vmatpush3.bf16.msra.mxu1 %v3588_v33  ;;  %v3115_v33 = vcombine.low %v1784_v30, %v1788_v32 }
 0x2c5   :  { %3308 = vmatprep.subr.bf16.mxu1 %v3682_v59 }
 0x2c8   :  { %3309 = vmatpush3.bf16.msra.mxu1 %v3589_v34  ;;  %v3116_v34 = vcombine.high %v1784_v30, %v1788_v32  ;;  %v3104_v32 = vcombine.high %v1774_v26, %v1778_v27 }
 0x2c9   :  { %3310 = vmatprep.subr.bf16.mxu1 %v3682_v59 }
 0x2ca   :  { %2662 = vmatprep.subr.bf16.mxu0 %v3116_v34  ;;  %v1786_v34 = vld [vmem:[%s4897_s13 + $0xa0] sm:$0xff] }
 0x2cb   :  { %2663 = vmatpush1.bf16.msra.mxu0 %v3115_v33  ;;  %v1782_v33 = vld [vmem:[%s4897_s13 + $0x80] sm:$0xff] }
 0x2cc   :  { %3311 = vmatpush3.bf16.msra.mxu1 %v3590_v35  ;;  %v1792_v35 = vld [vmem:[%s4897_s13 + $0xd0] sm:$0xff] }
 0x2cd   :  { %3312 = vmatprep.subr.bf16.mxu1 %v3682_v59 }
 0x2d0   :  { %3313 = vmatpush3.bf16.msra.mxu1 %v3591_v31  ;;  %v1796_v31 = vld [vmem:[%s4897_s13 + $0xf0] sm:$0xff] }
 0x2d1   :  { %3314 = vmatprep.subr.bf16.mxu1 %v3682_v59 }
 0x2d4   :  { %3315 = vmatpush3.bf16.msra.mxu1 %v3592_v36  ;;  %v3123_v36 = vcombine.low %v1792_v35, %v1796_v31 }
 0x2d5   :  { %3320 = vmatprep.subr.bf16.mxu1 %v3682_v59 }
 0x38a   :  { %v1379_v38 = vpop.f32.mrb[0].mxu1 }
 0x38b   :  { %v1380_v39 = vadd.f32 %v3052_v37, %v1379_v38  ;;  %v3298_v40 = vpop.f32.mrb[1].mxu1  ;;  %v3124_v37 = vcombine.high %v1792_v35, %v1796_v31  ;;  %v1800_v38 = vld [vmem:[%s4897_s13 + $0x110] sm:$0xff]  ;;  %v3103_v35 = vcombine.low %v1774_v26, %v1778_v27  ;;  %v3112_v31 = vcombine.high %v1782_v33, %v1786_v34 }
 0x38c   :  { %v1382_v41 = vpop.f32.mrb[2].mxu1 }
 0x38d   :  { %v1385_v42 = vmax.f32 %v1380_v39, 0.0  ;;  %v3299_v43 = vpop.f32.mrb[3].mxu1  ;;  %2664 = vmatprep.subr.bf16.mxu0 %v3124_v37  ;;  %v1804_v39 = vld [vmem:[%s4897_s13 + $0x130] sm:$0xff]  ;;  %v1794_v37 = vld [vmem:[%s4897_s13 + $0xe0] sm:$0xff] }
 0x38e   :  { %2665 = vmatpush1.bf16.msra.mxu0 %v3123_v36  ;;  %v3131_v40 = vcombine.low %v1800_v38, %v1804_v39  ;;  %v3132_v41 = vcombine.high %v1800_v38, %v1804_v39  ;;  %v1812_v43 = vld [vmem:[%s4897_s13 + $0x170] sm:$0xff]  ;;  %v1790_v36 = vld [vmem:[%s4897_s13 + $0xc0] sm:$0xff]  ;;  %v3111_v38 = vcombine.low %v1782_v33, %v1786_v34 }
 0x38f   :  { %v1386_v45 = vpack.c.bf16 %v1385_v42, %v1385_v42  ;;  %v1808_v42 = vld [vmem:[%s4897_s13 + $0x150] sm:$0xff]  ;;  %v3120_v39 = vcombine.high %v1790_v36, %v1794_v37 }
 0x390   :  { %2666 = vmatprep.subr.bf16.mxu0 %v3132_v41  ;;  %v1806_v41 = vld [vmem:[%s4897_s13 + $0x140] sm:$0xff]  ;;  %v1888_v33 = vld [vmem:[%s4897_s13 + $0x3d0] sm:$0xff] }
 0x391   :  { %3317 = vmatmul.mubr.bf16.vlgmr.msra.gmra.mrb[4].mxu1 %v1386_v45  ;;  %v3140_v45 = vcombine.high %v1808_v42, %v1812_v43  ;;  %v1892_v34 = vld [vmem:[%s4897_s13 + $0x3f0] sm:$0xff] }
 0x392   :  { %3321 = vmatpush3.bf16.msra.mxu1 %v3593_v44  ;;  %3336 = vmatprep.mubr.msk.bf16.mxu1 %vm3683_vm2, %v3682_v59  ;;  %v3139_v44 = vcombine.low %v1808_v42, %v1812_v43  ;;  %v1810_v42 = vld [vmem:[%s4897_s13 + $0x160] sm:$0xff]  ;;  %v3127_v43 = vcombine.low %v1798_v17, %v1802_v19 }
 0x393   :  { %3322 = vmatprep.subr.bf16.mxu1 %v3682_v59  ;;  %2667 = vmatpush1.bf16.msra.mxu0 %v3131_v40  ;;  %v3128_v40 = vcombine.high %v1798_v17, %v1802_v19  ;;  %v1629_v19 = vld [vmem:[%s4896_s12] sm:$0x3] }
 0x394   :  { %2668 = vmatprep.subr.bf16.mxu0 %v3140_v45  ;;  %v1814_v45 = vld [vmem:[%s4897_s13 + $0x180] sm:$0xff] }
 0x396   :  { %3323 = vmatpush3.bf16.msra.mxu1 %v3594_v46  ;;  %v1816_v46 = vld [vmem:[%s4897_s13 + $0x190] sm:$0xff] }
 0x397   :  { %3324 = vmatprep.subr.bf16.mxu1 %v3682_v59  ;;  %2669 = vmatpush1.bf16.msra.mxu0 %v3139_v44  ;;  %v3136_v44 = vcombine.high %v1806_v41, %v1810_v42 }
 0x39a   :  { %3325 = vmatpush3.bf16.msra.mxu1 %v3595_v47  ;;  %v1820_v47 = vld [vmem:[%s4897_s13 + $0x1b0] sm:$0xff] }
 0x39b   :  { %3326 = vmatprep.subr.bf16.mxu1 %v3682_v59 }
 0x39e   :  { %3327 = vmatpush3.bf16.msra.mxu1 %v3596_v48  ;;  %v3147_v48 = vcombine.low %v1816_v46, %v1820_v47 }
 0x39f   :  { %3328 = vmatprep.subr.bf16.mxu1 %v3682_v59 }
 0x3a2   :  { %3329 = vmatpush3.bf16.msra.mxu1 %v3597_v49  ;;  %v3148_v49 = vcombine.high %v1816_v46, %v1820_v47  ;;  %v1818_v46 = vld [vmem:[%s4897_s13 + $0x1a0] sm:$0xff]  ;;  %v3135_v47 = vcombine.low %v1806_v41, %v1810_v42 }
 0x3a3   :  { %3330 = vmatprep.subr.bf16.mxu1 %v3682_v59 }
 0x3a4   :  { %2670 = vmatprep.subr.bf16.mxu0 %v3148_v49  ;;  %v1822_v49 = vld [vmem:[%s4897_s13 + $0x1c0] sm:$0xff] }
 0x3a5   :  { %2671 = vmatpush1.bf16.msra.mxu0 %v3147_v48  ;;  %v3144_v48 = vcombine.high %v1814_v45, %v1818_v46 }
 0x3a6   :  { %3331 = vmatpush3.bf16.msra.mxu1 %v3598_v50  ;;  %v1824_v50 = vld [vmem:[%s4897_s13 + $0x1d0] sm:$0xff] }
 0x3a7   :  { %3332 = vmatprep.subr.bf16.mxu1 %v3682_v59 }
 0x3aa   :  { %3333 = vmatpush3.bf16.msra.mxu1 %v3599_v51  ;;  %v1828_v51 = vld [vmem:[%s4897_s13 + $0x1f0] sm:$0xff] }
 0x3ab   :  { %3334 = vmatprep.subr.bf16.mxu1 %v3682_v59 }
 0x3ae   :  { %3335 = vmatpush3.bf16.msra.mxu1 %v3600_v52  ;;  %v3155_v52 = vcombine.low %v1824_v50, %v1828_v51 }
 0x3af   :  { %1721 = vmatprep.subr.bf16.mxu1 %v3603_v53  ;;  %v3156_v53 = vcombine.high %v1824_v50, %v1828_v51  ;;  %v1826_v50 = vld [vmem:[%s4897_s13 + $0x1e0] sm:$0xff]  ;;  %v3143_v51 = vcombine.low %v1814_v45, %v1818_v46 }
 0x3b1   :  { %2672 = vmatprep.subr.bf16.mxu0 %v3156_v53  ;;  %v1830_v53 = vld [vmem:[%s4897_s13 + $0x200] sm:$0xff] }
 0x3b2   :  { %2673 = vmatpush1.bf16.msra.mxu0 %v3155_v52  ;;  %v3152_v52 = vcombine.high %v1822_v49, %v1826_v50 }
 0x464   :  { %v1492_v55 = vpop.f32.mrb[4].mxu1 }
 0x465   :  { %v1493_v56 = vadd.f32 %v3061_v54, %v1492_v55  ;;  %v3318_v57 = vpop.f32.mrb[5].mxu1  ;;  %v1832_v54 = vld [vmem:[%s4897_s13 + $0x210] sm:$0xff] }
 0x466   :  { %v1495_v58 = vpop.f32.mrb[6].mxu1  ;;  %v1836_v55 = vld [vmem:[%s4897_s13 + $0x230] sm:$0xff] }
 0x467   :  { %v1498_v60 = vmax.f32 %v1493_v56, 0.0  ;;  %v3319_v59 = vpop.f32.mrb[7].mxu1  ;;  %v3163_v56 = vcombine.low %v1832_v54, %v1836_v55  ;;  %v3164_v57 = vcombine.high %v1832_v54, %v1836_v55  ;;  %v1840_v58 = vld [vmem:[%s4897_s13 + $0x250] sm:$0xff]  ;;  %v1834_v54 = vld [vmem:[%s4897_s13 + $0x220] sm:$0xff]  ;;  %v3151_v55 = vcombine.low %v1822_v49, %v1826_v50  ;;  %v1775_v49 = vld [vmem:[%s4897_s13 + $0x48] sm:$0xff] }
 0x468   :  { %v1779_v50 = vld [vmem:[%s4897_s13 + $0x68] sm:$0xff] }
 0x469   :  { %v1499_v62 = vpack.c.bf16 %v1498_v60, %v1498_v60  ;;  %2674 = vmatprep.subr.bf16.mxu0 %v3164_v57  ;;  %v1844_v60 = vld [vmem:[%s4897_s13 + $0x270] sm:$0xff]  ;;  %v1838_v57 = vld [vmem:[%s4897_s13 + $0x240] sm:$0xff] }
 0x46a   :  { %2675 = vmatpush1.bf16.msra.mxu0 %v3163_v56  ;;  %v3171_v59 = vcombine.low %v1840_v58, %v1844_v60  ;;  %v3160_v56 = vcombine.high %v1830_v53, %v1834_v54 }
 0x46b   :  { %3337 = vmatmul.mubr.bf16.vlgmr.msra.gmra.mrb[8].mxu1 %v1499_v62  ;;  %v1848_v62 = vld [vmem:[%s4897_s13 + $0x290] sm:$0xff] }
 0x46c   :  { %1722 = vmatpush1.bf16.msra.mxu1 %v3601_v61  ;;  %1753 = vmatprep.mubr.bf16.mxu1 %v3684_v16  ;;  %v3172_v61 = vcombine.high %v1840_v58, %v1844_v60  ;;  %v1842_v58 = vld [vmem:[%s4897_s13 + $0x260] sm:$0xff]  ;;  %v3159_v60 = vcombine.low %v1830_v53, %v1834_v54  ;;  %v3106_v53 = vcombine.high %v1775_v49, %v1779_v50  ;;  %v1783_v54 = vld [vmem:[%s4897_s13 + $0x88] sm:$0xff] }
 0x46d   :  { %1723 = vmatprep.subr.bf16.mxu1 %v3606_v63  ;;  %v1852_v63 = vld [vmem:[%s4897_s13 + $0x2b0] sm:$0xff] }
 0x46e   :  { %2676 = vmatprep.subr.bf16.mxu0 %v3172_v61  ;;  %v1846_v61 = vld [vmem:[%s4897_s13 + $0x280] sm:$0xff] }
 0x46f   :  { %2677 = vmatpush1.bf16.msra.mxu0 %v3171_v59  ;;  %v3168_v59 = vcombine.high %v1838_v57, %v1842_v58 }
 0x470   :  { %1724 = vmatpush1.bf16.msra.mxu1 %v3604_v1  ;;  %v3179_v1 = vcombine.low %v1848_v62, %v1852_v63 }
 0x471   :  { %1725 = vmatprep.subr.bf16.mxu1 %v3609_v3  ;;  %v3180_v3 = vcombine.high %v1848_v62, %v1852_v63  ;;  %v1850_v62 = vld [vmem:[%s4897_s13 + $0x2a0] sm:$0xff]  ;;  %v3167_v63 = vcombine.low %v1838_v57, %v1842_v58  ;;  %v1791_v58 = vld [vmem:[%s4897_s13 + $0xc8] sm:$0xff] }
 0x473   :  { %2678 = vmatprep.subr.bf16.mxu0 %v3180_v3  ;;  %v1854_v3 = vld [vmem:[%s4897_s13 + $0x2c0] sm:$0xff] }
 0x474   :  { %1726 = vmatpush1.bf16.msra.mxu1 %v3607_v5  ;;  %2679 = vmatpush1.bf16.msra.mxu0 %v3179_v1  ;;  %v1856_v5 = vld [vmem:[%s4897_s13 + $0x2d0] sm:$0xff]  ;;  %v3176_v1 = vcombine.high %v1846_v61, %v1850_v62 }
 0x475   :  { %1727 = vmatprep.subr.bf16.mxu1 %v3612_v6  ;;  %v1860_v6 = vld [vmem:[%s4897_s13 + $0x2f0] sm:$0xff] }
 0x478   :  { %1728 = vmatpush1.bf16.msra.mxu1 %v3610_v7  ;;  %v3187_v7 = vcombine.low %v1856_v5, %v1860_v6 }
 0x479   :  { %1729 = vmatprep.subr.bf16.mxu1 %v3615_v8  ;;  %v3188_v8 = vcombine.high %v1856_v5, %v1860_v6  ;;  %v1858_v5 = vld [vmem:[%s4897_s13 + $0x2e0] sm:$0xff]  ;;  %v3175_v6 = vcombine.low %v1846_v61, %v1850_v62  ;;  %v1799_v62 = vld [vmem:[%s4897_s13 + $0x108] sm:$0xff] }
 0x47b   :  { %2680 = vmatprep.subr.bf16.mxu0 %v3188_v8  ;;  %v1862_v8 = vld [vmem:[%s4897_s13 + $0x300] sm:$0xff] }
 0x47c   :  { %1730 = vmatpush1.bf16.msra.mxu1 %v3613_v9  ;;  %2681 = vmatpush1.bf16.msra.mxu0 %v3187_v7  ;;  %v1864_v9 = vld [vmem:[%s4897_s13 + $0x310] sm:$0xff]  ;;  %v3184_v7 = vcombine.high %v1854_v3, %v1858_v5 }
 0x47d   :  { %1731 = vmatprep.subr.bf16.mxu1 %v3618_v10  ;;  %v1868_v10 = vld [vmem:[%s4897_s13 + $0x330] sm:$0xff] }
 0x480   :  { %1732 = vmatpush1.bf16.msra.mxu1 %v3616_v0  ;;  %v3195_v0 = vcombine.low %v1864_v9, %v1868_v10 }
 0x481   :  { %1733 = vmatprep.subr.bf16.mxu1 %v3621_v11  ;;  %v3196_v11 = vcombine.high %v1864_v9, %v1868_v10  ;;  %v1866_v9 = vld [vmem:[%s4897_s13 + $0x320] sm:$0xff]  ;;  %v3183_v10 = vcombine.low %v1854_v3, %v1858_v5  ;;  %v1807_v5 = vld [vmem:[%s4897_s13 + $0x148] sm:$0xff] }
 0x483   :  { %2682 = vmatprep.subr.bf16.mxu0 %v3196_v11  ;;  %v1870_v11 = vld [vmem:[%s4897_s13 + $0x340] sm:$0xff] }
 0x484   :  { %1734 = vmatpush1.bf16.msra.mxu1 %v3619_v12  ;;  %2683 = vmatpush1.bf16.msra.mxu0 %v3195_v0  ;;  %v1872_v12 = vld [vmem:[%s4897_s13 + $0x350] sm:$0xff]  ;;  %v3192_v0 = vcombine.high %v1862_v8, %v1866_v9 }
 0x485   :  { %1735 = vmatprep.subr.bf16.mxu1 %v3624_v13  ;;  %v1876_v13 = vld [vmem:[%s4897_s13 + $0x370] sm:$0xff] }
 0x486   :  { %v3204_v16 = vcombine.high %v1872_v12, %v1876_v13 }
 0x488   :  { %1736 = vmatpush1.bf16.msra.mxu1 %v3622_v14  ;;  %v3203_v14 = vcombine.low %v1872_v12, %v1876_v13  ;;  %2684 = vmatprep.subr.bf16.mxu0 %v3204_v16  ;;  %v1874_v12 = vld [vmem:[%s4897_s13 + $0x360] sm:$0xff]  ;;  %v3191_v13 = vcombine.low %v1862_v8, %v1866_v9  ;;  %v1815_v9 = vld [vmem:[%s4897_s13 + $0x188] sm:$0xff] }
 0x489   :  { %2576 = vmatprep.subr.bf16.mxu1 %v3096_v21  ;;  %v3070_v21 = vld [vmem:[%s4894_s10] ss:$0 sm:$0xff]  ;;  %v3199_v16 = vcombine.low %v1870_v11, %v1874_v12 }
 0x48a   :  { %2685 = vmatpush1.bf16.msra.mxu0 %v3203_v14  ;;  %v3200_v14 = vcombine.high %v1870_v11, %v1874_v12  ;;  %v1823_v12 = vld [vmem:[%s4897_s13 + $0x1c8] sm:$0xff] }
 0x53e   :  { %v1605_v22 = vpop.f32.mrb[8].mxu1 }
 0x53f   :  { %v1606_v23 = vadd.f32 %v3070_v21, %v1605_v22  ;;  %v3338_v24 = vpop.f32.mrb[9].mxu1  ;;  %v1878_v21 = vld [vmem:[%s4897_s13 + $0x380] sm:$0xff] }
 0x540   :  { %v1608_v25 = vpop.f32.mrb[10].mxu1  ;;  %v1882_v22 = vld [vmem:[%s4897_s13 + $0x3a0] sm:$0xff]  ;;  %v1880_v24 = vld [vmem:[%s4897_s13 + $0x390] sm:$0xff] }
 0x541   :  { %v1611_v28 = vmax.f32 %v1606_v23, 0.0  ;;  %v3339_v29 = vpop.f32.mrb[11].mxu1  ;;  %v3208_v23 = vcombine.high %v1878_v21, %v1882_v22  ;;  %v1884_v25 = vld [vmem:[%s4897_s13 + $0x3b0] sm:$0xff]  ;;  %v3207_v26 = vcombine.low %v1878_v21, %v1882_v22  ;;  %v1831_v21 = vld [vmem:[%s4897_s13 + $0x208] sm:$0xff] }
 0x542   :  { %v3212_v27 = vcombine.high %v1880_v24, %v1884_v25  ;;  %v1886_v29 = vld [vmem:[%s4897_s13 + $0x3c0] sm:$0xff]  ;;  %v1835_v22 = vld [vmem:[%s4897_s13 + $0x228] sm:$0xff] }
 0x543   :  { %v1612_v30 = vpack.c.bf16 %v1611_v28, %v1611_v28  ;;  %v3211_v28 = vcombine.low %v1880_v24, %v1884_v25  ;;  %v3162_v24 = vcombine.high %v1831_v21, %v1835_v22  ;;  %v1839_v25 = vld [vmem:[%s4897_s13 + $0x248] sm:$0xff] }
 0x544   :  { %2686 = vmatprep.subr.bf16.mxu0 %v3212_v27  ;;  %v3161_v27 = vcombine.low %v1831_v21, %v1835_v22  ;;  %v1825_v22 = vld [vmem:[%s4897_s13 + $0x1d8] sm:$0xff] }
 0x545   :  { %1754 = vmatmul.mubr.bf16.vlgmr.msra.gmra.mrb[12].mxu1 %v1612_v30  ;;  %v1890_v30 = vld [vmem:[%s4897_s13 + $0x3e0] sm:$0xff]  ;;  %2687 = vmatpush1.bf16.msra.mxu0 %v3211_v28 }
 0x546   :  { %2577 = vmatpush1.bf16.msra.mxu1 %v3095_v20  ;;  %v3119_v20 = vcombine.low %v1790_v36, %v1794_v37  ;;  %v3219_v36 = vcombine.low %v1888_v33, %v1892_v34  ;;  %v1767_v37 = vld [vmem:[%s4897_s13 + $0x8] sm:$0xff] }
 0x547   :  { %2578 = vmatprep.subr.bf16.mxu1 %v3104_v32  ;;  %v3216_v32 = vcombine.high %v1886_v29, %v1890_v30 }
 0x54a   :  { %2579 = vmatpush1.bf16.msra.mxu1 %v3103_v35  ;;  %v3215_v35 = vcombine.low %v1886_v29, %v1890_v30  ;;  %v1847_v29 = vld [vmem:[%s4897_s13 + $0x288] sm:$0xff] }
 0x54b   :  { %2580 = vmatprep.subr.bf16.mxu1 %v3112_v31  ;;  %v3220_v31 = vcombine.high %v1888_v33, %v1892_v34  ;;  %v1851_v30 = vld [vmem:[%s4897_s13 + $0x2a8] sm:$0xff] }
 0x54c   :  { %v3178_v33 = vcombine.high %v1847_v29, %v1851_v30  ;;  %v1855_v34 = vld [vmem:[%s4897_s13 + $0x2c8] sm:$0xff] }
 0x54d   :  { %2688 = vmatprep.subr.bf16.mxu0 %v3220_v31  ;;  %v3177_v31 = vcombine.low %v1847_v29, %v1851_v30  ;;  %v1841_v30 = vld [vmem:[%s4897_s13 + $0x258] sm:$0xff] }
 0x54e   :  { %2581 = vmatpush1.bf16.msra.mxu1 %v3111_v38  ;;  %v1771_v38 = vld [vmem:[%s4897_s13 + $0x28] sm:$0xff]  ;;  %2689 = vmatpush1.bf16.msra.mxu0 %v3219_v36 }
 0x54f   :  { %2582 = vmatprep.subr.bf16.mxu1 %v3120_v39  ;;  %v3098_v39 = vcombine.high %v1767_v37, %v1771_v38  ;;  %v3097_v17 = vcombine.low %v1767_v37, %v1771_v38  ;;  %v1863_v37 = vld [vmem:[%s4897_s13 + $0x308] sm:$0xff] }
 0x550   :  { %v1867_v38 = vld [vmem:[%s4897_s13 + $0x328] sm:$0xff] }
 0x552   :  { %2583 = vmatpush1.bf16.msra.mxu1 %v3119_v20  ;;  %v1634_v20 = vrot.slane %v1629_v19, %v4270_v2 }
 0x553   :  { %2584 = vmatprep.subr.bf16.mxu1 %v3128_v40  ;;  %v1638_v40 = vrot.slane %v1629_v19, %v4276_v4  ;;  %v1871_v19 = vld [vmem:[%s4897_s13 + $0x348] sm:$0xff] }
 0x556   :  { %2585 = vmatpush1.bf16.msra.mxu1 %v3127_v43 }
 0x557   :  { %2586 = vmatprep.subr.bf16.mxu1 %v3136_v44 }
 0x55a   :  { %2587 = vmatpush1.bf16.msra.mxu1 %v3135_v47 }
 0x55b   :  { %2588 = vmatprep.subr.bf16.mxu1 %v3144_v48 }
 0x55e   :  { %2589 = vmatpush1.bf16.msra.mxu1 %v3143_v51 }
 0x55f   :  { %2590 = vmatprep.subr.bf16.mxu1 %v3152_v52 }
 0x562   :  { %2591 = vmatpush1.bf16.msra.mxu1 %v3151_v55  ;;  %v1787_v55 = vld [vmem:[%s4897_s13 + $0xa8] sm:$0xff] }
 0x563   :  { %2592 = vmatprep.subr.bf16.mxu1 %v3160_v56  ;;  %v3105_v56 = vcombine.low %v1775_v49, %v1779_v50  ;;  %v3114_v57 = vcombine.high %v1783_v54, %v1787_v55  ;;  %v1769_v50 = vld [vmem:[%s4897_s13 + $0x18] sm:$0xff] }
 0x566   :  { %2593 = vmatpush1.bf16.msra.mxu1 %v3159_v60  ;;  %v1795_v60 = vld [vmem:[%s4897_s13 + $0xe8] sm:$0xff] }
 0x567   :  { %2594 = vmatprep.subr.bf16.mxu1 %v3168_v59  ;;  %v3113_v59 = vcombine.low %v1783_v54, %v1787_v55  ;;  %v3122_v61 = vcombine.high %v1791_v58, %v1795_v60 }
 0x56a   :  { %2595 = vmatpush1.bf16.msra.mxu1 %v3167_v63  ;;  %v1803_v63 = vld [vmem:[%s4897_s13 + $0x128] sm:$0xff] }
 0x56b   :  { %2596 = vmatprep.subr.bf16.mxu1 %v3176_v1  ;;  %v3121_v1 = vcombine.low %v1791_v58, %v1795_v60  ;;  %v3130_v3 = vcombine.high %v1799_v62, %v1803_v63 }
 0x56e   :  { %2597 = vmatpush1.bf16.msra.mxu1 %v3175_v6  ;;  %v1811_v6 = vld [vmem:[%s4897_s13 + $0x168] sm:$0xff] }
 0x56f   :  { %2598 = vmatprep.subr.bf16.mxu1 %v3184_v7  ;;  %v3129_v7 = vcombine.low %v1799_v62, %v1803_v63  ;;  %v3138_v8 = vcombine.high %v1807_v5, %v1811_v6 }
 0x572   :  { %2599 = vmatpush1.bf16.msra.mxu1 %v3183_v10  ;;  %v1819_v10 = vld [vmem:[%s4897_s13 + $0x1a8] sm:$0xff] }
 0x573   :  { %2600 = vmatprep.subr.bf16.mxu1 %v3192_v0  ;;  %v3137_v0 = vcombine.low %v1807_v5, %v1811_v6  ;;  %v3146_v11 = vcombine.high %v1815_v9, %v1819_v10 }
 0x576   :  { %2601 = vmatpush1.bf16.msra.mxu1 %v3191_v13  ;;  %v1827_v13 = vld [vmem:[%s4897_s13 + $0x1e8] sm:$0xff] }
 0x577   :  { %2602 = vmatprep.subr.bf16.mxu1 %v3200_v14  ;;  %v3145_v14 = vcombine.low %v1815_v9, %v1819_v10  ;;  %v1809_v10 = vld [vmem:[%s4897_s13 + $0x158] sm:$0xff] }
 0x57a   :  { %2603 = vmatpush1.bf16.msra.mxu1 %v3199_v16  ;;  %v3154_v16 = vcombine.high %v1823_v12, %v1827_v13 }
 0x57b   :  { %2604 = vmatprep.subr.bf16.mxu1 %v3208_v23  ;;  %v3153_v23 = vcombine.low %v1823_v12, %v1827_v13  ;;  %v1817_v13 = vld [vmem:[%s4897_s13 + $0x198] sm:$0xff] }
 0x57e   :  { %2605 = vmatpush1.bf16.msra.mxu1 %v3207_v26  ;;  %v1843_v26 = vld [vmem:[%s4897_s13 + $0x268] sm:$0xff] }
 0x57f   :  { %2606 = vmatprep.subr.bf16.mxu1 %v3216_v32  ;;  %v3170_v28 = vcombine.high %v1839_v25, %v1843_v26  ;;  %v3169_v32 = vcombine.low %v1839_v25, %v1843_v26  ;;  %v1833_v26 = vld [vmem:[%s4897_s13 + $0x218] sm:$0xff] }
 0x582   :  { %2607 = vmatpush1.bf16.msra.mxu1 %v3215_v35  ;;  %v1859_v35 = vld [vmem:[%s4897_s13 + $0x2e8] sm:$0xff] }
 0x583   :  { %2617 = vmatprep.subr.bf16.mxu1 %v3098_v39  ;;  %v3186_v36 = vcombine.high %v1855_v34, %v1859_v35  ;;  %v3185_v39 = vcombine.low %v1855_v34, %v1859_v35  ;;  %v1849_v35 = vld [vmem:[%s4897_s13 + $0x298] sm:$0xff] }
 0x618   :  { %v1755_v41 = vpop.f32.mrb[12].mxu1 }
 0x619   :  { %v1756_v42 = vadd.f32 %v1755_v41, %v1634_v20  ;;  %v1757_v43 = vpop.f32.mrb[13].mxu1  ;;  %v1875_v20 = vld [vmem:[%s4897_s13 + $0x368] sm:$0xff] }
 0x61a   :  { %v1758_v44 = vadd.f32 %v1757_v43, %v1638_v40  ;;  %v1759_v45 = vpop.f32.mrb[14].mxu1  ;;  %v3193_v40 = vcombine.low %v1863_v37, %v1867_v38  ;;  %v3202_v41 = vcombine.high %v1871_v19, %v1875_v20  ;;  %v1883_v43 = vld [vmem:[%s4897_s13 + $0x3a8] sm:$0xff] }
 0x61b   :  { %v1762_v46 = vmax.f32 %v1756_v42, 0.0  ;;  %v1760_v47 = vpop.f32.mrb[15].mxu1  ;;  %v1879_v42 = vld [vmem:[%s4897_s13 + $0x388] sm:$0xff] }
 0x61c   :  { %v1763_v48 = vmax.f32 %v1758_v44, 0.0  ;;  %v3201_v44 = vcombine.low %v1871_v19, %v1875_v20  ;;  %v3210_v45 = vcombine.high %v1879_v42, %v1883_v43  ;;  %v1891_v47 = vld [vmem:[%s4897_s13 + $0x3e8] sm:$0xff]  ;;  %v1865_v20 = vld [vmem:[%s4897_s13 + $0x318] sm:$0xff] }
 0x61d   :  { %v4639_v52 = vpack.c.bf16 %v1762_v46, %v1762_v46  ;;  %v1887_v46 = vld [vmem:[%s4897_s13 + $0x3c8] sm:$0xff] }
 0x61e   :  { %v4637_v51 = vpack.c.bf16 %v1763_v48, %v1763_v48  ;;  %v3209_v48 = vcombine.low %v1879_v42, %v1883_v43  ;;  %v3218_v49 = vcombine.high %v1887_v46, %v1891_v47  ;;  %v3217_v54 = vcombine.low %v1887_v46, %v1891_v47  ;;  %v1873_v43 = vld [vmem:[%s4897_s13 + $0x358] sm:$0xff] }
 0x61f   :  { %v1881_v47 = vld [vmem:[%s4897_s13 + $0x398] sm:$0xff] }
 0x620   :  { %2608 = vmatprep.mubr.bf16.mxu1 %v4637_v51  ;;  %2690 = vmatprep.mubr.bf16.mxu0 %v4637_v51 }
 0x621   :  { %2609 = vmatmul.mubr.bf16.vlgmr.msra.gmra.mrb[16].mxu1 %v4639_v52  ;;  %2691 = vmatmul.mubr.bf16.vlgmr.msra.gmra.mrb[8].mxu0 %v4639_v52 }
 0x622   :  { %2618 = vmatpush1.bf16.msra.mxu1 %v3097_v17  ;;  %2649 = vmatprep.mubr.bf16.mxu1 %v4637_v51  ;;  %v3194_v17 = vcombine.high %v1863_v37, %v1867_v38  ;;  %v1857_v38 = vld [vmem:[%s4897_s13 + $0x2d8] sm:$0xff] }
 0x623   :  { %2619 = vmatprep.subr.bf16.mxu1 %v3106_v53  ;;  %v1773_v53 = vld [vmem:[%s4897_s13 + $0x38] sm:$0xff] }
 0x624   :  { %v3102_v55 = vcombine.high %v1769_v50, %v1773_v53  ;;  %v3101_v58 = vcombine.low %v1769_v50, %v1773_v53  ;;  %v1889_v53 = vld [vmem:[%s4897_s13 + $0x3d8] sm:$0xff] }
 0x626   :  { %2620 = vmatpush1.bf16.msra.mxu1 %v3105_v56  ;;  %v1777_v56 = vld [vmem:[%s4897_s13 + $0x58] sm:$0xff] }
 0x627   :  { %2621 = vmatprep.subr.bf16.mxu1 %v3114_v57  ;;  %v1781_v57 = vld [vmem:[%s4897_s13 + $0x78] sm:$0xff] }
 0x628   :  { %v3110_v60 = vcombine.high %v1777_v56, %v1781_v57  ;;  %v3109_v62 = vcombine.low %v1777_v56, %v1781_v57 }
 0x62a   :  { %2622 = vmatpush1.bf16.msra.mxu1 %v3113_v59  ;;  %v1785_v59 = vld [vmem:[%s4897_s13 + $0x98] sm:$0xff] }
 0x62b   :  { %2623 = vmatprep.subr.bf16.mxu1 %v3122_v61  ;;  %v1789_v61 = vld [vmem:[%s4897_s13 + $0xb8] sm:$0xff] }
 0x62c   :  { %v3118_v63 = vcombine.high %v1785_v59, %v1789_v61  ;;  %v3117_v5 = vcombine.low %v1785_v59, %v1789_v61  ;;  %v1918_v59 = vsub.s32 5, %v3801_v15 }
 0x62e   :  { %2624 = vmatpush1.bf16.msra.mxu1 %v3121_v1  ;;  %v1793_v1 = vld [vmem:[%s4897_s13 + $0xd8] sm:$0xff] }
 0x62f   :  { %2625 = vmatprep.subr.bf16.mxu1 %v3130_v3  ;;  %v1797_v3 = vld [vmem:[%s4897_s13 + $0xf8] sm:$0xff] }
 0x630   :  { %v3126_v6 = vcombine.high %v1793_v1, %v1797_v3 }
 0x632   :  { %2626 = vmatpush1.bf16.msra.mxu1 %v3129_v7  ;;  %v1801_v7 = vld [vmem:[%s4897_s13 + $0x118] sm:$0xff] }
 0x633   :  { %2627 = vmatprep.subr.bf16.mxu1 %v3138_v8  ;;  %v3125_v8 = vcombine.low %v1793_v1, %v1797_v3 }
 0x636   :  { %2628 = vmatpush1.bf16.msra.mxu1 %v3137_v0  ;;  %v1813_v0 = vld [vmem:[%s4897_s13 + $0x178] sm:$0xff] }
 0x637   :  { %2629 = vmatprep.subr.bf16.mxu1 %v3146_v11  ;;  %v3142_v12 = vcombine.high %v1809_v10, %v1813_v0 }
 0x63a   :  { %2630 = vmatpush1.bf16.msra.mxu1 %v3145_v14  ;;  %v1821_v14 = vld [vmem:[%s4897_s13 + $0x1b8] sm:$0xff] }
 0x63b   :  { %2631 = vmatprep.subr.bf16.mxu1 %v3154_v16  ;;  %v3141_v16 = vcombine.low %v1809_v10, %v1813_v0  ;;  %v3150_v21 = vcombine.high %v1817_v13, %v1821_v14 }
 0x63e   :  { %2632 = vmatpush1.bf16.msra.mxu1 %v3153_v23  ;;  %v1829_v23 = vld [vmem:[%s4897_s13 + $0x1f8] sm:$0xff] }
 0x63f   :  { %2633 = vmatprep.subr.bf16.mxu1 %v3162_v24  ;;  %v3149_v24 = vcombine.low %v1817_v13, %v1821_v14  ;;  %v3158_v25 = vcombine.high %v1825_v22, %v1829_v23 }
 0x642   :  { %2634 = vmatpush1.bf16.msra.mxu1 %v3161_v27  ;;  %v1837_v27 = vld [vmem:[%s4897_s13 + $0x238] sm:$0xff] }
 0x643   :  { %2635 = vmatprep.subr.bf16.mxu1 %v3170_v28  ;;  %v3157_v28 = vcombine.low %v1825_v22, %v1829_v23  ;;  %v3166_v29 = vcombine.high %v1833_v26, %v1837_v27 }
 0x646   :  { %2636 = vmatpush1.bf16.msra.mxu1 %v3169_v32  ;;  %v1845_v32 = vld [vmem:[%s4897_s13 + $0x278] sm:$0xff] }
 0x647   :  { %2637 = vmatprep.subr.bf16.mxu1 %v3178_v33  ;;  %v3165_v33 = vcombine.low %v1833_v26, %v1837_v27  ;;  %v3174_v34 = vcombine.high %v1841_v30, %v1845_v32 }
 0x64a   :  { %2638 = vmatpush1.bf16.msra.mxu1 %v3177_v31  ;;  %v1853_v31 = vld [vmem:[%s4897_s13 + $0x2b8] sm:$0xff] }
 0x64b   :  { %2639 = vmatprep.subr.bf16.mxu1 %v3186_v36  ;;  %v3173_v36 = vcombine.low %v1841_v30, %v1845_v32  ;;  %v3182_v37 = vcombine.high %v1849_v35, %v1853_v31 }
 0x64e   :  { %2640 = vmatpush1.bf16.msra.mxu1 %v3185_v39  ;;  %v1861_v39 = vld [vmem:[%s4897_s13 + $0x2f8] sm:$0xff] }
 0x64f   :  { %2641 = vmatprep.subr.bf16.mxu1 %v3194_v17  ;;  %v3181_v17 = vcombine.low %v1849_v35, %v1853_v31  ;;  %v3190_v19 = vcombine.high %v1857_v38, %v1861_v39 }
 0x652   :  { %2642 = vmatpush1.bf16.msra.mxu1 %v3193_v40  ;;  %v1869_v40 = vld [vmem:[%s4897_s13 + $0x338] sm:$0xff] }
 0x653   :  { %2643 = vmatprep.subr.bf16.mxu1 %v3202_v41  ;;  %v3189_v41 = vcombine.low %v1857_v38, %v1861_v39  ;;  %v3198_v42 = vcombine.high %v1865_v20, %v1869_v40 }
 0x656   :  { %2644 = vmatpush1.bf16.msra.mxu1 %v3201_v44  ;;  %v1877_v44 = vld [vmem:[%s4897_s13 + $0x378] sm:$0xff] }
 0x657   :  { %2645 = vmatprep.subr.bf16.mxu1 %v3210_v45  ;;  %v3197_v45 = vcombine.low %v1865_v20, %v1869_v40  ;;  %v3206_v46 = vcombine.high %v1873_v43, %v1877_v44 }
 0x65a   :  { %2646 = vmatpush1.bf16.msra.mxu1 %v3209_v48  ;;  %v1885_v48 = vld [vmem:[%s4897_s13 + $0x3b8] sm:$0xff] }
 0x65b   :  { %2647 = vmatprep.subr.bf16.mxu1 %v3218_v49  ;;  %v3205_v49 = vcombine.low %v1873_v43, %v1877_v44  ;;  %v3214_v50 = vcombine.high %v1881_v47, %v1885_v48 }
 0x65e   :  { %2648 = vmatpush1.bf16.msra.mxu1 %v3217_v54  ;;  %v1893_v54 = vld [vmem:[%s4897_s13 + $0x3f8] sm:$0xff] }
 0x65f   :  { %2699 = vmatprep.subr.bf16.mxu1 %v3102_v55  ;;  %v3213_v55 = vcombine.low %v1881_v47, %v1885_v48  ;;  %v3222_v56 = vcombine.high %v1889_v53, %v1893_v54  ;;  %v3221_v57 = vcombine.low %v1889_v53, %v1893_v54 }
 0x661   :  { %2650 = vmatmul.mubr.bf16.vlgmr.msra.gmra.mrb[20].mxu1 %v4639_v52 }
 0x662   :  { %2700 = vmatpush1.bf16.msra.mxu1 %v3101_v58  ;;  %2731 = vmatprep.mubr.bf16.mxu1 %v4637_v51  ;;  %v1805_v51 = vld [vmem:[%s4897_s13 + $0x138] sm:$0xff]  ;;  %v1914_v58 = vsub.s32 4, %v3801_v15 }
 0x663   :  { %2701 = vmatprep.subr.bf16.mxu1 %v3110_v60  ;;  %v3134_v9 = vcombine.high %v1801_v7, %v1805_v51  ;;  %v3133_v11 = vcombine.low %v1801_v7, %v1805_v51  ;;  %v4833_v60 = vld [vmem:[%s4898_s14] sm:$0xff] }
 0x664   :  { %v1899_v61 = vrot.slane %v4833_v60, %v4270_v2  ;;  %v1919_v1 = vrot.slane %v4833_v60, %v1918_v59 }
 0x666   :  { %2702 = vmatpush1.bf16.msra.mxu1 %v3109_v62  ;;  %v1915_v62 = vrot.slane %v4833_v60, %v1914_v58 }
 0x667   :  { %2703 = vmatprep.subr.bf16.mxu1 %v3118_v63  ;;  %v1903_v63 = vrot.slane %v4833_v60, %v4276_v4 }
 0x66a   :  { %2704 = vmatpush1.bf16.msra.mxu1 %v3117_v5 }
 0x66b   :  { %2705 = vmatprep.subr.bf16.mxu1 %v3126_v6 }
 0x66e   :  { %2706 = vmatpush1.bf16.msra.mxu1 %v3125_v8 }
 0x66f   :  { %2707 = vmatprep.subr.bf16.mxu1 %v3134_v9 }
 0x672   :  { %2708 = vmatpush1.bf16.msra.mxu1 %v3133_v11 }
 0x673   :  { %2709 = vmatprep.subr.bf16.mxu1 %v3142_v12 }
 0x676   :  { %2710 = vmatpush1.bf16.msra.mxu1 %v3141_v16 }
 0x677   :  { %2711 = vmatprep.subr.bf16.mxu1 %v3150_v21 }
 0x67a   :  { %2712 = vmatpush1.bf16.msra.mxu1 %v3149_v24 }
 0x67b   :  { %2713 = vmatprep.subr.bf16.mxu1 %v3158_v25 }
 0x67e   :  { %2714 = vmatpush1.bf16.msra.mxu1 %v3157_v28 }
 0x67f   :  { %2715 = vmatprep.subr.bf16.mxu1 %v3166_v29 }
 0x682   :  { %2716 = vmatpush1.bf16.msra.mxu1 %v3165_v33 }
 0x683   :  { %2717 = vmatprep.subr.bf16.mxu1 %v3174_v34 }
 0x686   :  { %2718 = vmatpush1.bf16.msra.mxu1 %v3173_v36  ;;  %v1906_v36 = vsub.s32 2, %v3801_v15 }
 0x687   :  { %2719 = vmatprep.subr.bf16.mxu1 %v3182_v37  ;;  %v1910_v37 = vsub.s32 3, %v3801_v15 }
 0x688   :  { %v1907_v38 = vrot.slane %v4833_v60, %v1906_v36 }
 0x689   :  { %v1911_v39 = vrot.slane %v4833_v60, %v1910_v37 }
 0x68a   :  { %2720 = vmatpush1.bf16.msra.mxu1 %v3181_v17 }
 0x68b   :  { %2721 = vmatprep.subr.bf16.mxu1 %v3190_v19 }
 0x68e   :  { %2722 = vmatpush1.bf16.msra.mxu1 %v3189_v41 }
 0x68f   :  { %2723 = vmatprep.subr.bf16.mxu1 %v3198_v42 }
 0x692   :  { %2724 = vmatpush1.bf16.msra.mxu1 %v3197_v45 }
 0x693   :  { %2725 = vmatprep.subr.bf16.mxu1 %v3206_v46 }
 0x696   :  { %2726 = vmatpush1.bf16.msra.mxu1 %v3205_v49 }
 0x697   :  { %2727 = vmatprep.subr.bf16.mxu1 %v3214_v50 }
 0x69a   :  { %2728 = vmatpush1.bf16.msra.mxu1 %v3213_v55 }
 0x69b   :  { %2729 = vmatprep.subr.bf16.mxu1 %v3222_v56 }
 0x69e   :  { %2730 = vmatpush1.bf16.msra.mxu1 %v3221_v57 }
 0x6a1   :  { %2732 = vmatmul.mubr.bf16.vlgmr.msra.gmra.mrb[24].mxu1 %v4639_v52 }
 0x6f4   :  { %v2610_v52 = vpop.f32.mrb[16].mxu1  ;;  %v2692_v3 = vpop.f32.mrb[8].mxu0 }
 0x6f5   :  { %v2611_v5 = vadd.f32 %v2610_v52, %v1899_v61  ;;  %v2693_v6 = vadd.f32 %v2692_v3, %v1915_v62  ;;  %v2612_v7 = vpop.f32.mrb[17].mxu1  ;;  %v2694_v51 = vpop.f32.mrb[9].mxu0  ;;  %v1926_v52 = vsub.s32 7, %v3801_v15 }
 0x6f6   :  { %v2613_v8 = vadd.f32 %v2612_v7, %v1903_v63  ;;  %v2695_v9 = vadd.f32 %v2694_v51, %v1919_v1  ;;  %v2614_v10 = vpop.f32.mrb[18].mxu1  ;;  %v2696_v0 = vpop.f32.mrb[10].mxu0  ;;  %v1922_v1 = vsub.s32 6, %v3801_v15 }
 0x6f7   :  { %v3223_v11 = vmul.f32 -1.442695, %v2611_v5  ;;  %v3227_v12 = vmul.f32 -1.442695, %v2693_v6  ;;  %v2615_v2 = vpop.f32.mrb[19].mxu1  ;;  %v2697_v13 = vpop.f32.mrb[11].mxu0  ;;  %v1927_v5 = vrot.slane %v4833_v60, %v1926_v52 }
 0x6f8   :  { %v3224_v14 = vmul.f32 -1.442695, %v2613_v8  ;;  %v3228_v16 = vmul.f32 -1.442695, %v2695_v9  ;;  %v1923_v3 = vrot.slane %v4833_v60, %v1922_v1 }
 0x6f9   :  { %3625 = vpow2.f32 %v3223_v11 }
 0x6fa   :  { %3627 = vpow2.f32 %v3227_v12 }
 0x6fb   :  { %3629 = vpow2.f32 %v3224_v14 }
 0x6fc   :  { %3631 = vpow2.f32 %v3228_v16 }
 0x703   :  { %v3626_v4 = vpop.eup %3625 }
 0x704   :  { %v3628_v21 = vpop.eup %3627  ;;  %v2764_v22 = vadd.f32 1.0, %v3626_v4 }
 0x705   :  { %v3630_v23 = vpop.eup %3629  ;;  %v2768_v24 = vadd.f32 1.0, %v3628_v21 }
 0x706   :  { %v3632_v25 = vpop.eup %3631  ;;  %3633 = vrcp.f32 %v2764_v22  ;;  %v2765_v26 = vadd.f32 1.0, %v3630_v23 }
 0x707   :  { %3635 = vrcp.f32 %v2768_v24  ;;  %v2769_v27 = vadd.f32 1.0, %v3632_v25 }
 0x708   :  { %3637 = vrcp.f32 %v2765_v26 }
 0x709   :  { %3639 = vrcp.f32 %v2769_v27 }
 0x710   :  { %v3634_v28 = vpop.eup %3633 }
 0x711   :  { %v4842_v29 = vpop.eup %3635 }
 0x712   :  { %v3638_v30 = vpop.eup %3637 }
 0x713   :  { %v4844_v32 = vpop.eup %3639  ;;  %v2796_v33 = vcombine.low %v3634_v28, %v3638_v30  ;;  %v2797_v34 = vcombine.high %v3634_v28, %v3638_v30 }
 0x714   :  { %v2832_v35 = vcombine.low %v4842_v29, %v4844_v32  ;;  %v2833_v31 = vcombine.high %v4842_v29, %v4844_v32 }
 0x715   :  { %v2806_v55 = vrot.slane %v2796_v33, %v3810_v18  ;;  %v2813_v56 = vrot.slane %v2797_v34, %v3810_v18 }
 0x716   :  { %v2842_v21 = vrot.slane %v2832_v35, %v3810_v18  ;;  %v2849_v22 = vrot.slane %v2833_v31, %v3810_v18 }
 0x734   :  { %v2651_v17 = vpop.f32.mrb[20].mxu1 }
 0x735   :  { %v2652_v19 = vadd.f32 %v2651_v17, %v1907_v38  ;;  %v2653_v20 = vpop.f32.mrb[21].mxu1 }
 0x736   :  { %v2654_v40 = vadd.f32 %v2653_v20, %v1911_v39  ;;  %v2655_v41 = vpop.f32.mrb[22].mxu1 }
 0x737   :  { %v3225_v42 = vmul.f32 -1.442695, %v2652_v19  ;;  %v2656_v43 = vpop.f32.mrb[23].mxu1 }
 0x738   :  { %v3226_v44 = vmul.f32 -1.442695, %v2654_v40 }
 0x739   :  { %3641 = vpow2.f32 %v3225_v42 }
 0x73a   :  { %3643 = vpow2.f32 %v3226_v44 }
 0x743   :  { %v3642_v45 = vpop.eup %3641 }
 0x744   :  { %v3644_v46 = vpop.eup %3643  ;;  %v2766_v47 = vadd.f32 1.0, %v3642_v45 }
 0x745   :  { %v2767_v48 = vadd.f32 1.0, %v3644_v46 }
 0x746   :  { %3645 = vrcp.f32 %v2766_v47 }
 0x747   :  { %3647 = vrcp.f32 %v2767_v48 }
 0x750   :  { %v3646_v49 = vpop.eup %3645 }
 0x751   :  { %v3648_v50 = vpop.eup %3647 }
 0x752   :  { %v2798_v53 = vcombine.low %v3646_v49, %v3648_v50  ;;  %v2799_v54 = vcombine.high %v3646_v49, %v3648_v50 }
 0x754   :  { %v2820_v57 = vrot.slane %v2798_v53, %v3810_v18  ;;  %v2827_v58 = vrot.slane %v2799_v54, %v3810_v18 }
 0x756   :  { %v2828_v59 = vcombine.low %v2806_v55, %v2820_v57  ;;  %v2829_v61 = vcombine.high %v2806_v55, %v2820_v57  ;;  %v2830_v62 = vcombine.low %v2813_v56, %v2827_v58  ;;  %v2831_v63 = vcombine.high %v2813_v56, %v2827_v58 }
 0x758   :  { %2876 = vst [vmem:[#allocation2] sm:$0xff] %v2828_v59  ;;  %2885 = vst [vmem:[#allocation2 + $0x10] sm:$0xff] %v2829_v61 }
 0x759   :  { %2887 = vst [vmem:[#allocation2 + $0x20] sm:$0xff] %v2830_v62  ;;  %2889 = vst [vmem:[#allocation2 + $0x30] sm:$0xff] %v2831_v63 }
 0x774   :  { %v2733_v6 = vpop.f32.mrb[24].mxu1 }
 0x775   :  { %v2734_v7 = vadd.f32 %v2733_v6, %v1923_v3  ;;  %v2735_v51 = vpop.f32.mrb[25].mxu1 }
 0x776   :  { %v2736_v8 = vadd.f32 %v2735_v51, %v1927_v5  ;;  %v2737_v9 = vpop.f32.mrb[26].mxu1 }
 0x777   :  { %v3229_v10 = vmul.f32 -1.442695, %v2734_v7  ;;  %v2738_v0 = vpop.f32.mrb[27].mxu1 }
 0x778   :  { %v3230_v11 = vmul.f32 -1.442695, %v2736_v8 }
 0x779   :  { %3649 = vpow2.f32 %v3229_v10 }
 0x77a   :  { %3651 = vpow2.f32 %v3230_v11 }
 0x783   :  { %v3650_v12 = vpop.eup %3649 }
 0x784   :  { %v3652_v2 = vpop.eup %3651  ;;  %v2770_v13 = vadd.f32 1.0, %v3650_v12 }
 0x785   :  { %v2771_v14 = vadd.f32 1.0, %v3652_v2 }
 0x786   :  { %3653 = vrcp.f32 %v2770_v13 }
 0x787   :  { %3655 = vrcp.f32 %v2771_v14 }
 0x790   :  { %v3654_v15 = vpop.eup %3653 }
 0x791   :  { %v3656_v60 = vpop.eup %3655 }
 0x792   :  { %v2834_v16 = vcombine.low %v3654_v15, %v3656_v60  ;;  %v2835_v4 = vcombine.high %v3654_v15, %v3656_v60 }
 0x794   :  { %v2856_v23 = vrot.slane %v2834_v16, %v3810_v18  ;;  %v2863_v24 = vrot.slane %v2835_v4, %v3810_v18 }
 0x796   :  { %v2864_v25 = vcombine.low %v2842_v21, %v2856_v23  ;;  %v2865_v26 = vcombine.high %v2842_v21, %v2856_v23  ;;  %v2866_v27 = vcombine.low %v2849_v22, %v2863_v24  ;;  %v2867_v28 = vcombine.high %v2849_v22, %v2863_v24 }
 0x798   :  { %2884 = vst.msk [vmem:[#allocation2 + $0x8] sm:$0xff] %vm2883_vm9, %v2864_v25  ;;  %2886 = vst.msk [vmem:[#allocation2 + $0x18] sm:$0xff] %vm2883_vm9, %v2865_v26 }
 0x799   :  { %2888 = vst.msk [vmem:[#allocation2 + $0x28] sm:$0xff] %vm2883_vm9, %v2866_v27  ;;  %2890 = vst.msk [vmem:[#allocation2 + $0x38] sm:$0xff] %vm2883_vm9, %v2867_v28 }
 0x79a   :  { %2895 = vsyncadd [#allocation3], 768  ;;  %s3685_s13 = smov [#allocation2]  }
 0x79b   :  { %s2896_s14 = sshll.u32 %s3685_s13, 4  ;;  %s2897_s14 = int_to_ptr.vmem [resolvable:$true] %s2896_s14 }
 0x79c   :  { %s3657_s10 = scalar_lea.vmem %s2897_s14, 256  ;;  %s3661_s29 = scalar_lea.vmem %s2897_s14, 1024 }
 0x79d   :  { %p3658_p0 = scmp.ne.s32.totalorder %s2897_s14, %s3657_s10  ;;  %p3662_p1 = scmp.lt.s32.totalorder %s2897_s14, %s2897_s14 }
 0x79e   :  { %p3663_p2 = scmp.lt.s32.totalorder %s3661_s29, %s3657_s10 }
 0x7a0   :  { %p3664_p3 = por %p3663_p2, %p3662_p1 }
 0x7a2   :  { %p3665_p4 = pnand %p3664_p3, %p3658_p0 }
 0x7a4   :  { %3668 = shalt.err (!%p3665_p4)
}
 0x7a5   :  { %s3669_s17 = scalar_lea.hbm %s4899_s15, 256 }
 0x7a6   :  { %p3670_p5 = scmp.ne.s32.totalorder %s4899_s15, %s3669_s17  ;;  %p3673_p6 = scmp.lt.u32.totalorder %s3669_s17, %s4899_s15 }
 0x7a8   :  { %p3675_p7 = pnand %p3673_p6, %p3670_p5 }
 0x7aa   :  { %3678 = shalt.err (!%p3675_p7)
}
 0x7ab   :  { %s3686_s20 = smov 256   ;;  %s3687_s21 = smov 16  }
 0x7ac   :  { %2902 = dma.vmem_to_hbm [thread:$0]  %s2897_s14, 256, %s4899_s15, [#allocation3], %s3686_s20, %s3686_s20, %s3687_s21  }
 0x7ad   :  { %3679 = dma.done.wait [#allocation3], 1024  }
 0x7ae   :  { %3680 = vsyncadd [#allocation3], 4294966272 }
 0x7af   :  { %2906 = vsyncpa [#allocation3], 1 }

</bundles_post_ra>
